<compile_context>
chip_gen: v7x
topology: tpu7x:2x2x1
jax: 0.10.0
libtpu: 0.0.40
codegen_flags: <defaults>
</compile_context>

<pallas_src>
import math
import functools

import jax
import jax.numpy as jnp
from jax.experimental import pallas as pl
from jax.experimental.pallas import tpu as pltpu


def _round_up(x, m):
    return (x + m - 1) // m * m


@functools.lru_cache(maxsize=None)
def _vmem_limit_bytes():
    """Per-generation scoped-VMEM limit (None -> keep the compiler default)."""
    try:
        kind = jax.devices()[0].device_kind.lower()
    except Exception:
        return None
    if any(tag in kind for tag in ("v4", "v5", "v6")):
        return 96 * 1024 * 1024      # 128 MiB physical VMEM on these chips
    if "v7" in kind:
        return 48 * 1024 * 1024      # v7x: 64 MiB per TensorCore
    return None


def _fused_conv_kernel(scale_ref, x_ref, w_ref, b_ref, o_ref, ximg_ref, *,
                       tap_offsets, tm, offpad, num_m_tiles):
    """One (image, OC-tile, M-tile) grid step of the fused im2col conv.

    scale_ref : SMEM (1,) f32      combined scale = act_scale * weight_scale
    x_ref     : (1, FLAT, C) int8  flattened padded image (resident per image)
    w_ref     : (T, C, TOC)  bf16  integer-valued weight taps (resident)
    b_ref     : (1, TOC)     f32   bias slice
    o_ref     : (1, TM, TOC) f32   output tile (anchors x out-channels)
    ximg_ref  : (FLAT, C)    f32   scratch: decoded image (persists over grid)
    """
    # Decode the int8 image into the f32 scratch once per batch element.  The
    # j / mi axes are "arbitrary" (sequential, in order), so (j, mi) == (0, 0)
    # is guaranteed to run before any other step of the same image, including
    # under megacore partitioning of the (parallel) batch axis.
    @pl.when((pl.program_id(1) == 0) & (pl.program_id(2) == 0))
    def _():
        ximg_ref[...] = x_ref[0].astype(jnp.float32)

    toc = o_ref.shape[2]

    if num_m_tiles > 1:
        start = pl.multiple_of(pl.program_id(2) * tm, 8)
        win = ximg_ref[pl.ds(start, tm + offpad), :]     # (tm + offpad, C) f32

    acc = jnp.zeros((tm, toc), jnp.float32)
    for t, off in enumerate(tap_offsets):
        if num_m_tiles > 1:
            xs = win[off:off + tm, :]
        else:
            xs = ximg_ref[off:off + tm, :]               # static slice
        # Integer values |v| <= 127 are exact in bf16 -> full-rate MXU dot with
        # exact f32 accumulation (exact while C*KH*KW*127^2 < 2^24).
        acc = acc + jnp.dot(xs.astype(jnp.bfloat16), w_ref[t],
                            preferred_element_type=jnp.float32)

    o_ref[0] = acc * scale_ref[0] + b_ref[...]


@functools.partial(jax.jit,
                   static_argnames=("stride", "padding", "dilation", "groups"))
def custom_conv2d(x, weight, bias, *, stride=1, padding=0, dilation=1, groups=1):
    """Forward of custom_Conv2d: fake-quant act & weight, conv2d + bias.

    x:      (N, C, H, W)     float32
    weight: (OC, C, KH, KW)  float32
    bias:   (OC,)            float32 (or None)
    returns (N, OC, OH, OW)  float32
    """
    assert groups == 1, "TODO(synk): groups > 1 not supported"
    x = x.astype(jnp.float32)
    n, c, h, w = x.shape
    oc, c_w, kh_, kw_ = weight.shape
    assert c_w == c and kh_ == kw_
    k = kh_
    s, p, d = stride, padding, dilation

    oh = (h + 2 * p - d * (k - 1) - 1) // s + 1
    ow = (w + 2 * p - d * (k - 1) - 1) // s + 1
    hp, wp = h + 2 * p, w + 2 * p

    # ---- per-tensor symmetric 8-bit fake-quant scales -----------------------
    a_scale = jnp.maximum(jnp.max(jnp.abs(x)), 1e-8) / 127.0
    w_scale = jnp.maximum(jnp.max(jnp.abs(weight)), 1e-8) / 127.0

    xq = jnp.clip(jnp.round(x / a_scale), -127.0, 127.0).astype(jnp.int8)
    wq = jnp.clip(jnp.round(weight / w_scale), -127.0, 127.0).astype(jnp.bfloat16)

    # ---- flattened, zero-padded NHWC image ----------------------------------
    xq = jnp.transpose(xq, (0, 2, 3, 1))                       # NHWC int8
    xq = jnp.pad(xq, ((0, 0), (p, p), (p, p), (0, 0)))
    x_flat = xq.reshape(n, hp * wp, c)

    # anchor a = r*WP + col is the conv window whose top-left padded pixel is
    # (r, col); tap (kh, kw) reads flat row a + kh*d*WP + kw*d.
    taps = tuple(ikh * d * wp + ikw * d for ikh in range(k) for ikw in range(k))
    t = k * k
    off_max = taps[-1]
    offpad = _round_up(off_max, 8)

    r_rows = (oh - 1) * s + 1
    lm = r_rows * wp                 # anchors kept so extraction is a reshape

    # ---- OC / M tiling under the per-generation VMEM budget -----------------
    if oc <= 512:
        toc, ocp = oc, oc
    else:
        toc = 512
        ocp = _round_up(oc, toc)

    vmem_limit = _vmem_limit_bytes()
    budget = int(0.55 * (vmem_limit if vmem_limit else 32 * 1024 * 1024))

    def _vmem_use(tm_, lm_pad_):
        flat_ = lm_pad_ + offpad
        return (2 * flat_ * c * 1          # int8 image stream (double-buffered)
                + flat_ * c * 4            # decoded f32 scratch
                + 2 * t * c * toc * 2      # resident bf16 weight taps
                + 2 * tm_ * toc * 4        # f32 output tile (double-buffered)
                + 8 * toc)

    tm = _round_up(lm, 8)
    lm_pad = tm
    while _vmem_use(tm, lm_pad) > budget and tm > 1024:
        tm = _round_up(tm // 2, 8)
        lm_pad = _round_up(lm, tm)
    num_m = lm_pad // tm

    flat = lm_pad + offpad
    if flat >= hp * wp:
        x_flat = jnp.pad(x_flat, ((0, 0), (0, flat - hp * wp), (0, 0)))
    else:
        x_flat = x_flat[:, :flat, :]       # trailing rows only feed garbage anchors

    # weight taps (T, C, OCp) bf16, bias (1, OCp) f32
    w_taps = jnp.transpose(wq, (2, 3, 1, 0)).reshape(t, c, oc)
    bvec = (jnp.zeros((oc,), jnp.float32) if bias is None
            else bias.astype(jnp.float32))
    if ocp != oc:
        w_taps = jnp.pad(w_taps, ((0, 0), (0, 0), (0, ocp - oc)))
        bvec = jnp.pad(bvec, ((0, ocp - oc),))
    b2 = bvec.reshape(1, ocp)

    out_scale = (a_scale * w_scale).reshape(1).astype(jnp.float32)

    kernel = functools.partial(_fused_conv_kernel, tap_offsets=taps, tm=tm,
                               offpad=offpad, num_m_tiles=num_m)

    compiler_kwargs = dict(
        dimension_semantics=("parallel", "arbitrary", "arbitrary"))
    if vmem_limit is not None:
        compiler_kwargs["vmem_limit_bytes"] = vmem_limit

    out_flat = pl.pallas_call(
        kernel,
        out_shape=jax.ShapeDtypeStruct((n, lm_pad, ocp), jnp.float32),
        grid_spec=pltpu.PrefetchScalarGridSpec(
            num_scalar_prefetch=1,                     # combined scale -> SMEM
            grid=(n, ocp // toc, num_m),
            in_specs=[
                pl.BlockSpec((1, flat, c), lambda b, j, mi, sc: (b, 0, 0)),
                pl.BlockSpec((t, c, toc), lambda b, j, mi, sc: (0, 0, j)),
                pl.BlockSpec((1, toc), lambda b, j, mi, sc: (0, j)),
            ],
            out_specs=pl.BlockSpec((1, tm, toc), lambda b, j, mi, sc: (b, mi, j)),
            scratch_shapes=[pltpu.VMEM((flat, c), jnp.float32)],
        ),
        compiler_params=pltpu.CompilerParams(**compiler_kwargs),
    )(out_scale, x_flat, w_taps, b2)

    # extract valid anchors -> (N, OH, OW, OC) -> NCHW
    out = out_flat[:, :lm, :oc].reshape(n, r_rows, wp, oc)
    out = out[:, ::s, ::s, :][:, :oh, :ow, :]
    return jnp.transpose(out, (0, 3, 1, 2))


def _init_params(key, in_channels, out_channels, kernel_size):
    """kaiming_uniform_(a=sqrt(5)) weight + uniform bias (PyTorch defaults)."""
    kw, kb = jax.random.split(key)
    fan_in = in_channels * kernel_size * kernel_size
    bound = 1.0 / math.sqrt(fan_in)
    weight = jax.random.uniform(
        kw, (out_channels, in_channels, kernel_size, kernel_size),
        minval=-bound, maxval=bound, dtype=jnp.float32)
    bias = jax.random.uniform(
        kb, (out_channels,), minval=-bound, maxval=bound, dtype=jnp.float32)
    return weight, bias


def _reference(x, weight, bias, stride, padding, dilation):
    """Pure-JAX reference of the same fake-quantized conv."""
    a_s = jnp.maximum(jnp.max(jnp.abs(x)), 1e-8) / 127.0
    w_s = jnp.maximum(jnp.max(jnp.abs(weight)), 1e-8) / 127.0
    xq = jnp.clip(jnp.round(x / a_s), -127.0, 127.0) * a_s
    wq = jnp.clip(jnp.round(weight / w_s), -127.0, 127.0) * w_s
    out = jax.lax.conv_general_dilated(
        xq, wq,
        window_strides=(stride, stride),
        padding=[(padding, padding), (padding, padding)],
        rhs_dilation=(dilation, dilation),
        dimension_numbers=("NCHW", "OIHW", "NCHW"))
    return out + bias.reshape(1, -1, 1, 1)


if __name__ == "__main__":
    key = jax.random.PRNGKey(0)
    kx, kp = jax.random.split(key)

    N, C, H, W = 2, 4, 16, 16
    OC, K = 8, 3
    stride, padding, dilation = 1, 1, 1

    x = jax.random.normal(kx, (N, C, H, W), dtype=jnp.float32)
    weight, bias = _init_params(kp, C, OC, K)

    out = custom_conv2d(x, weight, bias, stride=stride, padding=padding,
                        dilation=dilation, groups=1)
    out = jax.block_until_ready(out)

    ref = _reference(x, weight, bias, stride, padding, dilation)
    assert out.shape == (N, OC, H, W), out.shape
    err = float(jnp.max(jnp.abs(out - ref)))
    assert err < 1e-3, err

    print("KERNEL_OK")
</pallas_src>

<mosaic_0001>
module attributes {stable_mosaic.version = 11 : i64} {
  func.func @_fused_conv_kernel(%arg0: i32, %arg1: i32, %arg2: i32, %arg3: memref<1xf32, #tpu.memory_space<smem>>, %arg4: memref<1x328x4xi8, #tpu.memory_space<vmem>>, %arg5: memref<9x4x8xbf16, #tpu.memory_space<vmem>>, %arg6: memref<1x8xf32, #tpu.memory_space<vmem>>, %arg7: memref<1x288x8xf32, #tpu.memory_space<vmem>>, %arg8: memref<328x4xf32, #tpu.memory_space<vmem>>) attributes {dimension_semantics = [#tpu.dimension_semantics<parallel>, #tpu.dimension_semantics<arbitrary>, #tpu.dimension_semantics<arbitrary>], iteration_bounds = array<i64: 2, 1, 1>, scalar_prefetch = 1 : i64, scratch_operands = 1 : i64, tpu.core_type = #tpu.core_type<tc>, window_params = [{transform_indices = @transform_0, window_bounds = array<i64: 1, 328, 4>}, {transform_indices = @transform_1, window_bounds = array<i64: 9, 4, 8>}, {transform_indices = @transform_2, window_bounds = array<i64: 1, 8>}, {transform_indices = @transform_3, window_bounds = array<i64: 1, 288, 8>}]} {
    %c0_i32 = arith.constant 0 : i32
    %0 = arith.cmpi eq, %arg1, %c0_i32 : i32
    %c0_i32_0 = arith.constant 0 : i32
    %1 = arith.cmpi eq, %arg2, %c0_i32_0 : i32
    %2 = arith.andi %0, %1 : i1
    %3 = arith.extui %2 : i1 to i32
    %c0_i32_1 = arith.constant 0 : i32
    %4 = arith.cmpi ne, %3, %c0_i32_1 : i32
    scf.if %4 {
      %c0_47 = arith.constant 0 : index
      %c0_48 = arith.constant 0 : index
      %c0_49 = arith.constant 0 : index
      %69 = vector.load %arg4[%c0_47, %c0_48, %c0_49] : memref<1x328x4xi8, #tpu.memory_space<vmem>>, vector<1x328x4xi8>
      %70 = vector.shape_cast %69 : vector<1x328x4xi8> to vector<328x4xi8>
      %71 = arith.sitofp %70 : vector<328x4xi8> to vector<328x4xf32>
      %c0_50 = arith.constant 0 : index
      %c0_51 = arith.constant 0 : index
      %72 = vector.load %arg8[%c0_50, %c0_51] : memref<328x4xf32, #tpu.memory_space<vmem>>, vector<328x4xf32>
      tpu.vector_store %arg8[%c0_50, %c0_51], %71 {strides = array<i32>} : memref<328x4xf32, #tpu.memory_space<vmem>>, vector<328x4xf32>,
    } else {
    }
    %cst = arith.constant 0.000000e+00 : f32
    %5 = vector.broadcast %cst : f32 to vector<288x8xf32>
    %c0 = arith.constant 0 : index
    %c0_2 = arith.constant 0 : index
    %6 = vector.load %arg8[%c0, %c0_2] : memref<328x4xf32, #tpu.memory_space<vmem>>, vector<288x4xf32>
    %7 = arith.truncf %6 : vector<288x4xf32> to vector<288x4xbf16>
    %c0_3 = arith.constant 0 : index
    %c0_4 = arith.constant 0 : index
    %c0_5 = arith.constant 0 : index
    %8 = vector.load %arg5[%c0_3, %c0_4, %c0_5] : memref<9x4x8xbf16, #tpu.memory_space<vmem>>, vector<1x4x8xbf16>
    %9 = vector.shape_cast %8 : vector<1x4x8xbf16> to vector<4x8xbf16>
    %cst_6 = arith.constant dense<0.000000e+00> : vector<288x8xf32>
    %10 = tpu.matmul %7, %9, %cst_6 {dimension_numbers = #tpu.dot_dimension_numbers<[1], [0], [0], [1], [0, 0, 1, 1], [], []>} : vector<288x4xbf16>, vector<4x8xbf16>, vector<288x8xf32> -> vector<288x8xf32>
    %11 = arith.addf %5, %10 : vector<288x8xf32>
    %c1 = arith.constant 1 : index
    %c0_7 = arith.constant 0 : index
    %12 = vector.load %arg8[%c1, %c0_7] : memref<328x4xf32, #tpu.memory_space<vmem>>, vector<288x4xf32>
    %13 = arith.truncf %12 : vector<288x4xf32> to vector<288x4xbf16>
    %c1_8 = arith.constant 1 : index
    %c0_9 = arith.constant 0 : index
    %c0_10 = arith.constant 0 : index
    %14 = vector.load %arg5[%c1_8, %c0_9, %c0_10] : memref<9x4x8xbf16, #tpu.memory_space<vmem>>, vector<1x4x8xbf16>
    %15 = vector.shape_cast %14 : vector<1x4x8xbf16> to vector<4x8xbf16>
    %cst_11 = arith.constant dense<0.000000e+00> : vector<288x8xf32>
    %16 = tpu.matmul %13, %15, %cst_11 {dimension_numbers = #tpu.dot_dimension_numbers<[1], [0], [0], [1], [0, 0, 1, 1], [], []>} : vector<288x4xbf16>, vector<4x8xbf16>, vector<288x8xf32> -> vector<288x8xf32>
    %17 = arith.addf %11, %16 : vector<288x8xf32>
    %c2 = arith.constant 2 : index
    %c0_12 = arith.constant 0 : index
    %18 = vector.load %arg8[%c2, %c0_12] : memref<328x4xf32, #tpu.memory_space<vmem>>, vector<288x4xf32>
    %19 = arith.truncf %18 : vector<288x4xf32> to vector<288x4xbf16>
    %c2_13 = arith.constant 2 : index
    %c0_14 = arith.constant 0 : index
    %c0_15 = arith.constant 0 : index
    %20 = vector.load %arg5[%c2_13, %c0_14, %c0_15] : memref<9x4x8xbf16, #tpu.memory_space<vmem>>, vector<1x4x8xbf16>
    %21 = vector.shape_cast %20 : vector<1x4x8xbf16> to vector<4x8xbf16>
    %cst_16 = arith.constant dense<0.000000e+00> : vector<288x8xf32>
    %22 = tpu.matmul %19, %21, %cst_16 {dimension_numbers = #tpu.dot_dimension_numbers<[1], [0], [0], [1], [0, 0, 1, 1], [], []>} : vector<288x4xbf16>, vector<4x8xbf16>, vector<288x8xf32> -> vector<288x8xf32>
    %23 = arith.addf %17, %22 : vector<288x8xf32>
    %c18 = arith.constant 18 : index
    %c0_17 = arith.constant 0 : index
    %24 = vector.load %arg8[%c18, %c0_17] : memref<328x4xf32, #tpu.memory_space<vmem>>, vector<288x4xf32>
    %25 = arith.truncf %24 : vector<288x4xf32> to vector<288x4xbf16>
    %c3 = arith.constant 3 : index
    %c0_18 = arith.constant 0 : index
    %c0_19 = arith.constant 0 : index
    %26 = vector.load %arg5[%c3, %c0_18, %c0_19] : memref<9x4x8xbf16, #tpu.memory_space<vmem>>, vector<1x4x8xbf16>
    %27 = vector.shape_cast %26 : vector<1x4x8xbf16> to vector<4x8xbf16>
    %cst_20 = arith.constant dense<0.000000e+00> : vector<288x8xf32>
    %28 = tpu.matmul %25, %27, %cst_20 {dimension_numbers = #tpu.dot_dimension_numbers<[1], [0], [0], [1], [0, 0, 1, 1], [], []>} : vector<288x4xbf16>, vector<4x8xbf16>, vector<288x8xf32> -> vector<288x8xf32>
    %29 = arith.addf %23, %28 : vector<288x8xf32>
    %c19 = arith.constant 19 : index
    %c0_21 = arith.constant 0 : index
    %30 = vector.load %arg8[%c19, %c0_21] : memref<328x4xf32, #tpu.memory_space<vmem>>, vector<288x4xf32>
    %31 = arith.truncf %30 : vector<288x4xf32> to vector<288x4xbf16>
    %c4 = arith.constant 4 : index
    %c0_22 = arith.constant 0 : index
    %c0_23 = arith.constant 0 : index
    %32 = vector.load %arg5[%c4, %c0_22, %c0_23] : memref<9x4x8xbf16, #tpu.memory_space<vmem>>, vector<1x4x8xbf16>
    %33 = vector.shape_cast %32 : vector<1x4x8xbf16> to vector<4x8xbf16>
    %cst_24 = arith.constant dense<0.000000e+00> : vector<288x8xf32>
    %34 = tpu.matmul %31, %33, %cst_24 {dimension_numbers = #tpu.dot_dimension_numbers<[1], [0], [0], [1], [0, 0, 1, 1], [], []>} : vector<288x4xbf16>, vector<4x8xbf16>, vector<288x8xf32> -> vector<288x8xf32>
    %35 = arith.addf %29, %34 : vector<288x8xf32>
    %c20 = arith.constant 20 : index
    %c0_25 = arith.constant 0 : index
    %36 = vector.load %arg8[%c20, %c0_25] : memref<328x4xf32, #tpu.memory_space<vmem>>, vector<288x4xf32>
    %37 = arith.truncf %36 : vector<288x4xf32> to vector<288x4xbf16>
    %c5 = arith.constant 5 : index
    %c0_26 = arith.constant 0 : index
    %c0_27 = arith.constant 0 : index
    %38 = vector.load %arg5[%c5, %c0_26, %c0_27] : memref<9x4x8xbf16, #tpu.memory_space<vmem>>, vector<1x4x8xbf16>
    %39 = vector.shape_cast %38 : vector<1x4x8xbf16> to vector<4x8xbf16>
    %cst_28 = arith.constant dense<0.000000e+00> : vector<288x8xf32>
    %40 = tpu.matmul %37, %39, %cst_28 {dimension_numbers = #tpu.dot_dimension_numbers<[1], [0], [0], [1], [0, 0, 1, 1], [], []>} : vector<288x4xbf16>, vector<4x8xbf16>, vector<288x8xf32> -> vector<288x8xf32>
    %41 = arith.addf %35, %40 : vector<288x8xf32>
    %c36 = arith.constant 36 : index
    %c0_29 = arith.constant 0 : index
    %42 = vector.load %arg8[%c36, %c0_29] : memref<328x4xf32, #tpu.memory_space<vmem>>, vector<288x4xf32>
    %43 = arith.truncf %42 : vector<288x4xf32> to vector<288x4xbf16>
    %c6 = arith.constant 6 : index
    %c0_30 = arith.constant 0 : index
    %c0_31 = arith.constant 0 : index
    %44 = vector.load %arg5[%c6, %c0_30, %c0_31] : memref<9x4x8xbf16, #tpu.memory_space<vmem>>, vector<1x4x8xbf16>
    %45 = vector.shape_cast %44 : vector<1x4x8xbf16> to vector<4x8xbf16>
    %cst_32 = arith.constant dense<0.000000e+00> : vector<288x8xf32>
    %46 = tpu.matmul %43, %45, %cst_32 {dimension_numbers = #tpu.dot_dimension_numbers<[1], [0], [0], [1], [0, 0, 1, 1], [], []>} : vector<288x4xbf16>, vector<4x8xbf16>, vector<288x8xf32> -> vector<288x8xf32>
    %47 = arith.addf %41, %46 : vector<288x8xf32>
    %c37 = arith.constant 37 : index
    %c0_33 = arith.constant 0 : index
    %48 = vector.load %arg8[%c37, %c0_33] : memref<328x4xf32, #tpu.memory_space<vmem>>, vector<288x4xf32>
    %49 = arith.truncf %48 : vector<288x4xf32> to vector<288x4xbf16>
    %c7 = arith.constant 7 : index
    %c0_34 = arith.constant 0 : index
    %c0_35 = arith.constant 0 : index
    %50 = vector.load %arg5[%c7, %c0_34, %c0_35] : memref<9x4x8xbf16, #tpu.memory_space<vmem>>, vector<1x4x8xbf16>
    %51 = vector.shape_cast %50 : vector<1x4x8xbf16> to vector<4x8xbf16>
    %cst_36 = arith.constant dense<0.000000e+00> : vector<288x8xf32>
    %52 = tpu.matmul %49, %51, %cst_36 {dimension_numbers = #tpu.dot_dimension_numbers<[1], [0], [0], [1], [0, 0, 1, 1], [], []>} : vector<288x4xbf16>, vector<4x8xbf16>, vector<288x8xf32> -> vector<288x8xf32>
    %53 = arith.addf %47, %52 : vector<288x8xf32>
    %c38 = arith.constant 38 : index
    %c0_37 = arith.constant 0 : index
    %54 = vector.load %arg8[%c38, %c0_37] : memref<328x4xf32, #tpu.memory_space<vmem>>, vector<288x4xf32>
    %55 = arith.truncf %54 : vector<288x4xf32> to vector<288x4xbf16>
    %c8 = arith.constant 8 : index
    %c0_38 = arith.constant 0 : index
    %c0_39 = arith.constant 0 : index
    %56 = vector.load %arg5[%c8, %c0_38, %c0_39] : memref<9x4x8xbf16, #tpu.memory_space<vmem>>, vector<1x4x8xbf16>
    %57 = vector.shape_cast %56 : vector<1x4x8xbf16> to vector<4x8xbf16>
    %cst_40 = arith.constant dense<0.000000e+00> : vector<288x8xf32>
    %58 = tpu.matmul %55, %57, %cst_40 {dimension_numbers = #tpu.dot_dimension_numbers<[1], [0], [0], [1], [0, 0, 1, 1], [], []>} : vector<288x4xbf16>, vector<4x8xbf16>, vector<288x8xf32> -> vector<288x8xf32>
    %59 = arith.addf %53, %58 : vector<288x8xf32>
    %c0_41 = arith.constant 0 : index
    %60 = memref.load %arg3[%c0_41] : memref<1xf32, #tpu.memory_space<smem>>
    %61 = vector.broadcast %60 : f32 to vector<288x8xf32>
    %62 = arith.mulf %59, %61 : vector<288x8xf32>
    %c0_42 = arith.constant 0 : index
    %c0_43 = arith.constant 0 : index
    %63 = vector.load %arg6[%c0_42, %c0_43] : memref<1x8xf32, #tpu.memory_space<vmem>>, vector<1x8xf32>
    %64 = vector.broadcast %63 : vector<1x8xf32> to vector<288x8xf32>
    %65 = arith.addf %62, %64 : vector<288x8xf32>
    %c0_44 = arith.constant 0 : index
    %c0_45 = arith.constant 0 : index
    %c0_46 = arith.constant 0 : index
    %66 = vector.load %arg7[%c0_44, %c0_45, %c0_46] : memref<1x288x8xf32, #tpu.memory_space<vmem>>, vector<1x288x8xf32>
    %67 = vector.shape_cast %66 : vector<1x288x8xf32> to vector<288x8xf32>
    %68 = vector.shape_cast %65 : vector<288x8xf32> to vector<1x288x8xf32>
    tpu.vector_store %arg7[%c0_44, %c0_45, %c0_46], %68 {strides = array<i32>} : memref<1x288x8xf32, #tpu.memory_space<vmem>>, vector<1x288x8xf32>,
    return
  }
  func.func @transform_0(%arg0: i32, %arg1: i32, %arg2: i32, %arg3: memref<1xf32, #tpu.memory_space<smem>>) -> (i32, i32, i32) {
    %c0_i32 = arith.constant 0 : i32
    %c0_i32_0 = arith.constant 0 : i32
    %c0_i32_1 = arith.constant 0 : i32
    return %arg0, %c0_i32, %c0_i32_0 : i32, i32, i32
  }
  func.func @transform_1(%arg0: i32, %arg1: i32, %arg2: i32, %arg3: memref<1xf32, #tpu.memory_space<smem>>) -> (i32, i32, i32) {
    %c0_i32 = arith.constant 0 : i32
    %c0_i32_0 = arith.constant 0 : i32
    %c0_i32_1 = arith.constant 0 : i32
    return %c0_i32, %c0_i32_0, %arg1 : i32, i32, i32
  }
  func.func @transform_2(%arg0: i32, %arg1: i32, %arg2: i32, %arg3: memref<1xf32, #tpu.memory_space<smem>>) -> (i32, i32) {
    %c0_i32 = arith.constant 0 : i32
    %c0_i32_0 = arith.constant 0 : i32
    return %c0_i32, %arg1 : i32, i32
  }
  func.func @transform_3(%arg0: i32, %arg1: i32, %arg2: i32, %arg3: memref<1xf32, #tpu.memory_space<smem>>) -> (i32, i32, i32) {
    %c0_i32 = arith.constant 0 : i32
    return %arg0, %arg2, %arg1 : i32, i32, i32
  }
}

</mosaic_0001>

<bundles_post_ra>
// kernel: custom_conv2d.1
= control target key start
LH: loop header
LB: loop body
LE: loop exit
PB: predicated region body
PF: predicated region fallthrough
CT: control target
= control target key end

     0   :  { %s4688_s17 = smov 0   ;;  %s4690_s18 = smov 0   ;;  %s5356_s0 = inlined_call_operand.<no memory space> [shape: f32[1], index: 0, kind: input, shape index: {}]   ;;  %s5357_s1 = inlined_call_operand.vmem [shape: s8[2,328,4], index: 1, kind: input, shape index: {}]   ;;  %s5358_s2 = inlined_call_operand.vmem [shape: bf16[9,4,8], index: 2, kind: input, shape index: {}]   ;;  %s5359_s3 = inlined_call_operand.vmem [shape: f32[1,8], index: 3, kind: input, shape index: {}]   ;;  %s5360_s4 = inlined_call_operand.vmem [shape: f32[2,288,8], index: 4, kind: output, shape index: {}]  }
   0x1   :  { %9 = sst [smem:[#allocation4]] %s5356_s0  ;;  %s4692_s19 = smov 0  }
   0x2 LB: > { %s34_s0 = sadd.s32 1, %s4654_s18  ;;  %p3522_p0 = scmp.ge.s32.totalorder %s4658_s19, 1  ;;  %s4658_s19 = sphi %s4692_s19, %s15_s19   ;;  %s4654_s18 = sphi %s4690_s18, %s5362_s18   ;;  %s4650_s17 = sphi %s4688_s17, %s5361_s17  }
   0x3   : > { %p36_p1 = scmp.ge.s32.totalorder %s34_s0, 2  ;;  %p179_p2 = scmp.lt.s32.totalorder %s4658_s19, 3 }
   0x5   : > { %s5364_s0 = smov (%p36_p1, %s34_s0), 0  ;;  %p180_p3 = pnand %p3522_p0, %p179_p2 }
   0x6   : > { %vm580_vm0 = vcmask (!%p180_p3), 1041408   ;;  %v4709_v0 = vld [vmem:[%s5358_s2 + $0x8] sm:$0x3] (!%p180_p3)  ;;  %v3525_v1 = vld [vmem:[%s5358_s2 + $0x2] sm:$0x3] (!%p180_p3)  ;;  %p217_p4 = scmp.lt.s32.totalorder (!%p180_p3), %s4650_s17, 1 }
   0x7   : > { %183 = sbr.rel (%p180_p3) target bundleno = 578 (0x242), region = 32  ;;  %4604 = vmatprep.subr.msk.bf16.mxu0 (!%p180_p3), %vm580_vm0, %v4709_v0  ;;  %4600 = vmatprep.subr.msk.bf16.mxu1 (!%p180_p3), %vm580_vm0, %v3525_v1  ;;  %v4719_v2 = vsel (!%p180_p3), %vm580_vm0, %v4709_v0, 0  ;;  %v582_v3 = vsel (!%p180_p3), %vm580_vm0, %v3525_v1, 0  ;;  %v3619_v4 = vld [vmem:[%s5358_s2 + $0xa] sm:$0x3] (!%p180_p3)  ;;  %vm372_vm1 = vcmask (!%p180_p3), 31744  }
   0x8   : > { %4102 = vmatpush3.bf16.msra.mxu0 (!%p180_p3), %v4719_v2  ;;  %3950 = vmatpush3.bf16.msra.mxu1 (!%p180_p3), %v582_v3  ;;  %v468_v5 = vld [vmem:[%s5358_s2] sm:$0x3] (!%p180_p3)  ;;  %v4742_v8 = vsel (!%p180_p3), %vm580_vm0, %v3619_v4, 0  ;;  %s3277_s16 = sld [smem:[#allocation4]] (!%p180_p3)  ;;  %vm3358_vm2 = vcmask (!%p180_p3), 64512  }
   0x9   : > { %4606 = vmatprep.subr.msk.bf16.mxu0 (!%p180_p3), %vm580_vm0, %v3619_v4  ;;  %4601 = vmatprep.subr.msk.bf16.mxu1 (!%p180_p3), %vm580_vm0, %v468_v5  ;;  %v4745_v9 = vsel (!%p180_p3), %vm580_vm0, %v468_v5, 0 }
   0xe   : > { %s5366_s17 = smov (!%p217_p4, %s4650_s17), 1 }
   0xf   : > { %s4610_s28 = smul.u32 82, %s5366_s17 }
  0x10   : > { %s4611_s20 = smul.u32 288, %s5366_s17 }
  0x11   : > { %s4737_s5 = scalar_lea.vmem %s5357_s1, %s4610_s28 }
  0x12   : > { %v3699_v6 = vld [vmem:[%s4737_s5] sm:$0xff]   ;;  %v4582_v7 = vld [vmem:[%s4737_s5 + $0x8] sm:$0xff]   ;;  %v4584_v14 = vld [vmem:[%s4737_s5 + $0x10] sm:$0xff]   ;;  %s5193_s17 = scalar_lea.vmem %s5360_s4, %s4611_s20 }
  0x13   : > { %v3700_v10 = vunpack.c.0.s8 %v3699_v6  ;;  %v3701_v11 = vunpack.c.1.s8 %v3699_v6  ;;  %v3704_v12 = vunpack.c.2.s8 %v3699_v6  ;;  %v3705_v13 = vunpack.c.3.s8 %v3699_v6  ;;  %v4586_v23 = vld [vmem:[%s4737_s5 + $0x18] sm:$0xff]   ;;  %v4588_v32 = vld [vmem:[%s4737_s5 + $0x20] sm:$0xff]   ;;  %v4590_v41 = vld [vmem:[%s4737_s5 + $0x28] sm:$0xff]  }
  0x14   : > { %v3708_v15 = vunpack.c.0.s8 %v4582_v7  ;;  %v3709_v16 = vunpack.c.1.s8 %v4582_v7  ;;  %v3712_v17 = vunpack.c.2.s8 %v4582_v7  ;;  %v3713_v18 = vunpack.c.3.s8 %v4582_v7  ;;  %v4592_v50 = vld [vmem:[%s4737_s5 + $0x30] sm:$0xff]   ;;  %v4769_v59 = vld [vmem:[%s4737_s5 + $0x38] sm:$0xff]  }
  0x15   : > { %v331_v19 = vcvt.s32.f32 %v3700_v10  ;;  %v332_v20 = vcvt.s32.f32 %v3701_v11  ;;  %v333_v21 = vcvt.s32.f32 %v3704_v12  ;;  %v334_v22 = vcvt.s32.f32 %v3705_v13 }
  0x16   : > { %v335_v24 = vcvt.s32.f32 %v3708_v15  ;;  %v336_v25 = vcvt.s32.f32 %v3709_v16  ;;  %v337_v26 = vcvt.s32.f32 %v3712_v17  ;;  %v3716_v27 = vunpack.c.0.s8 %v4584_v14 }
  0x17   : > { %373 = vst.msk [vmem:[#allocation2] sm:$0xff] %vm372_vm1, %v331_v19  ;;  %374 = vst.msk [vmem:[#allocation2 + $0x8] sm:$0xff] %vm372_vm1, %v332_v20  ;;  %v338_v28 = vcvt.s32.f32 %v3713_v18  ;;  %v3717_v29 = vunpack.c.1.s8 %v4584_v14  ;;  %v3720_v30 = vunpack.c.2.s8 %v4584_v14  ;;  %v3721_v31 = vunpack.c.3.s8 %v4584_v14  ;;  %v4776_v14 = vld [vmem:[%s4737_s5 + $0x40] sm:$0xff]  }
  0x18   : > { %375 = vst.msk [vmem:[#allocation2 + $0x10] sm:$0xff] %vm372_vm1, %v333_v21  ;;  %376 = vst.msk [vmem:[#allocation2 + $0x18] sm:$0xff] %vm372_vm1, %v334_v22  ;;  %v339_v33 = vcvt.s32.f32 %v3716_v27  ;;  %v3724_v34 = vunpack.c.0.s8 %v4586_v23  ;;  %v3725_v35 = vunpack.c.1.s8 %v4586_v23  ;;  %v3728_v36 = vunpack.c.2.s8 %v4586_v23 }
  0x19   : > { %377 = vst.msk [vmem:[#allocation2 + $0x20] sm:$0xff] %vm372_vm1, %v335_v24  ;;  %378 = vst.msk [vmem:[#allocation2 + $0x28] sm:$0xff] %vm372_vm1, %v336_v25  ;;  %v340_v37 = vcvt.s32.f32 %v3717_v29  ;;  %v341_v38 = vcvt.s32.f32 %v3720_v30  ;;  %v342_v39 = vcvt.s32.f32 %v3721_v31  ;;  %v3729_v40 = vunpack.c.3.s8 %v4586_v23 }
  0x1a   : > { %379 = vst.msk [vmem:[#allocation2 + $0x30] sm:$0xff] %vm372_vm1, %v337_v26  ;;  %380 = vst.msk [vmem:[#allocation2 + $0x38] sm:$0xff] %vm372_vm1, %v338_v28  ;;  %v343_v42 = vcvt.s32.f32 %v3724_v34  ;;  %v344_v43 = vcvt.s32.f32 %v3725_v35  ;;  %v345_v44 = vcvt.s32.f32 %v3728_v36  ;;  %v3732_v45 = vunpack.c.0.s8 %v4588_v32  ;;  %v4796_v35 = vld [vmem:[%s5358_s2 + $0x4] sm:$0x3] }
  0x1b   : > { %381 = vst.msk [vmem:[#allocation2 + $0x40] sm:$0xff] %vm372_vm1, %v339_v33  ;;  %382 = vst.msk [vmem:[#allocation2 + $0x48] sm:$0xff] %vm372_vm1, %v340_v37  ;;  %v346_v46 = vcvt.s32.f32 %v3729_v40  ;;  %v3733_v47 = vunpack.c.1.s8 %v4588_v32  ;;  %v3736_v48 = vunpack.c.2.s8 %v4588_v32  ;;  %v3737_v49 = vunpack.c.3.s8 %v4588_v32  ;;  %v4789_v32 = vld [vmem:[%s5358_s2 + $0xc] sm:$0x3] }
  0x1c   : > { %383 = vst.msk [vmem:[#allocation2 + $0x50] sm:$0xff] %vm372_vm1, %v341_v38  ;;  %384 = vst.msk [vmem:[#allocation2 + $0x58] sm:$0xff] %vm372_vm1, %v342_v39  ;;  %v347_v51 = vcvt.s32.f32 %v3732_v45  ;;  %v3740_v52 = vunpack.c.0.s8 %v4590_v41  ;;  %v3741_v53 = vunpack.c.1.s8 %v4590_v41  ;;  %v3744_v54 = vunpack.c.2.s8 %v4590_v41  ;;  %v4809_v45 = vld [vmem:[%s4737_s5 + $0x48] sm:$0xff]  }
  0x1d   : > { %385 = vst.msk [vmem:[#allocation2 + $0x60] sm:$0xff] %vm372_vm1, %v343_v42  ;;  %386 = vst.msk [vmem:[#allocation2 + $0x68] sm:$0xff] %vm372_vm1, %v344_v43  ;;  %v348_v55 = vcvt.s32.f32 %v3733_v47  ;;  %v349_v56 = vcvt.s32.f32 %v3736_v48  ;;  %v350_v57 = vcvt.s32.f32 %v3737_v49  ;;  %v3745_v58 = vunpack.c.3.s8 %v4590_v41 }
  0x1e   : > { %387 = vst.msk [vmem:[#allocation2 + $0x70] sm:$0xff] %vm372_vm1, %v345_v44  ;;  %388 = vst.msk [vmem:[#allocation2 + $0x78] sm:$0xff] %vm372_vm1, %v346_v46  ;;  %v469_v60 = vld [vmem:[#allocation2 + $0x1] sm:$0xff]  ;;  %v351_v63 = vcvt.s32.f32 %v3740_v52  ;;  %v352_v1 = vcvt.s32.f32 %v3741_v53  ;;  %v353_v3 = vcvt.s32.f32 %v3744_v54  ;;  %v3748_v4 = vunpack.c.0.s8 %v4592_v50 }
  0x1f   : > { %v470_v61 = vld [vmem:[#allocation2 + $0x9] sm:$0xff]  ;;  %v1647_v62 = vld [vmem:[#allocation2 + $0x13] sm:$0xff]  ;;  %389 = vst.msk [vmem:[#allocation2 + $0x80] sm:$0xff] %vm372_vm1, %v347_v51  ;;  %390 = vst.msk [vmem:[#allocation2 + $0x88] sm:$0xff] %vm372_vm1, %v348_v55  ;;  %v354_v11 = vcvt.s32.f32 %v3745_v58  ;;  %v3749_v12 = vunpack.c.1.s8 %v4592_v50  ;;  %v3752_v13 = vunpack.c.2.s8 %v4592_v50  ;;  %v3753_v21 = vunpack.c.3.s8 %v4592_v50 }
  0x20   : > { %v505_v5 = vpack.c.bf16 %v470_v61, %v469_v60  ;;  %v1648_v6 = vld [vmem:[#allocation2 + $0x1b] sm:$0xff]  ;;  %v471_v7 = vld [vmem:[#allocation2 + $0x11] sm:$0xff]  ;;  %391 = vst.msk [vmem:[#allocation2 + $0x90] sm:$0xff] %vm372_vm1, %v349_v56  ;;  %392 = vst.msk [vmem:[#allocation2 + $0x98] sm:$0xff] %vm372_vm1, %v350_v57  ;;  %v355_v20 = vcvt.s32.f32 %v3748_v4  ;;  %v3756_v28 = vunpack.c.0.s8 %v4769_v59  ;;  %v3757_v34 = vunpack.c.1.s8 %v4769_v59 }
  0x21   : > { %v472_v10 = vld [vmem:[#allocation2 + $0x19] sm:$0xff]  ;;  %v1683_v15 = vpack.c.bf16 %v1648_v6, %v1647_v62  ;;  %v1649_v17 = vld [vmem:[#allocation2 + $0x23] sm:$0xff]  ;;  %v1650_v18 = vld [vmem:[#allocation2 + $0x2b] sm:$0xff]  ;;  %393 = vst.msk [vmem:[#allocation2 + $0xa0] sm:$0xff] %vm372_vm1, %v351_v63  ;;  %v356_v26 = vcvt.s32.f32 %v3749_v12  ;;  %v357_v27 = vcvt.s32.f32 %v3752_v13  ;;  %v358_v33 = vcvt.s32.f32 %v3753_v21 }
  0x22   : > { %v506_v16 = vpack.c.bf16 %v472_v10, %v471_v7  ;;  %v473_v19 = vld [vmem:[#allocation2 + $0x21] sm:$0xff]  ;;  %394 = vst.msk [vmem:[#allocation2 + $0xa8] sm:$0xff] %vm372_vm1, %v352_v1  ;;  %395 = vst.msk [vmem:[#allocation2 + $0xb0] sm:$0xff] %vm372_vm1, %v353_v3  ;;  %3951 = vmatprep.mubr.msk.bf16.mxu1 %vm372_vm1, %v505_v5  ;;  %v1684_v22 = vpack.c.bf16 %v1650_v18, %v1649_v17  ;;  %v474_v23 = vld [vmem:[#allocation2 + $0x29] sm:$0xff]  ;;  %v359_v39 = vcvt.s32.f32 %v3756_v28  ;;  %v3760_v40 = vunpack.c.2.s8 %v4769_v59 }
  0x23   : > { %v1651_v24 = vld [vmem:[#allocation2 + $0x33] sm:$0xff]  ;;  %v1652_v25 = vld [vmem:[#allocation2 + $0x3b] sm:$0xff]  ;;  %396 = vst.msk [vmem:[#allocation2 + $0xb8] sm:$0xff] %vm372_vm1, %v354_v11  ;;  %4103 = vmatprep.mubr.msk.bf16.mxu0 %vm372_vm1, %v1683_v15  ;;  %v507_v29 = vpack.c.bf16 %v474_v23, %v473_v19  ;;  %397 = vst.msk [vmem:[#allocation2 + $0xc0] sm:$0xff] %vm372_vm1, %v355_v20  ;;  %v3761_v41 = vunpack.c.3.s8 %v4769_v59  ;;  %v3764_v44 = vunpack.c.0.s8 %v4776_v14  ;;  %v3765_v49 = vunpack.c.1.s8 %v4776_v14 }
  0x24   : > { %3952 = vmatmul.mubr.msk.bf16.vlgmr.msra.gmra.mrb[0].mxu1 %vm372_vm1, %v506_v16  ;;  %v1685_v30 = vpack.c.bf16 %v1652_v25, %v1651_v24  ;;  %v475_v31 = vld [vmem:[#allocation2 + $0x31] sm:$0xff]  ;;  %4104 = vmatmul.mubr.msk.bf16.vlgmr.msra.gmra.mrb[0].mxu0 %vm372_vm1, %v1684_v22  ;;  %v476_v36 = vld [vmem:[#allocation2 + $0x39] sm:$0xff]  ;;  %v1653_v37 = vld [vmem:[#allocation2 + $0x43] sm:$0xff]  ;;  %398 = vst.msk [vmem:[#allocation2 + $0xc8] sm:$0xff] %vm372_vm1, %v356_v26  ;;  %v3768_v53 = vunpack.c.2.s8 %v4776_v14  ;;  %v3769_v56 = vunpack.c.3.s8 %v4776_v14  ;;  %v3772_v57 = vunpack.c.0.s8 %v4809_v45 }
  0x25   : > { %3988 = vmatpush3.bf16.msra.mxu1 %v4745_v9  ;;  %v1654_v38 = vld [vmem:[#allocation2 + $0x4b] sm:$0xff]  ;;  %399 = vst.msk [vmem:[#allocation2 + $0xd0] sm:$0xff] %vm372_vm1, %v357_v27  ;;  %4140 = vmatpush3.bf16.msra.mxu0 %v4742_v8  ;;  %v477_v42 = vld [vmem:[#allocation2 + $0x41] sm:$0xff]  ;;  %400 = vst.msk [vmem:[#allocation2 + $0xd8] sm:$0xff] %vm372_vm1, %v358_v33  ;;  %v360_v9 = vcvt.s32.f32 %v3757_v34  ;;  %v361_v8 = vcvt.s32.f32 %v3760_v40  ;;  %v362_v48 = vcvt.s32.f32 %v3761_v41  ;;  %v508_v50 = vpack.c.bf16 %v476_v36, %v475_v31 }
  0x26   : > { %3955 = vmatprep.mubr.msk.bf16.mxu1 %vm372_vm1, %v507_v29  ;;  %v478_v43 = vld [vmem:[#allocation2 + $0x49] sm:$0xff]  ;;  %4107 = vmatprep.mubr.msk.bf16.mxu0 %vm372_vm1, %v1685_v30  ;;  %v1655_v46 = vld [vmem:[#allocation2 + $0x53] sm:$0xff]  ;;  %v1656_v47 = vld [vmem:[#allocation2 + $0x5b] sm:$0xff]  ;;  %401 = vst.msk [vmem:[#allocation2 + $0xe0] sm:$0xff] %vm372_vm1, %v359_v39  ;;  %v1686_v51 = vpack.c.bf16 %v1654_v38, %v1653_v37  ;;  %v363_v52 = vcvt.s32.f32 %v3764_v44  ;;  %v364_v55 = vcvt.s32.f32 %v3765_v49  ;;  %v365_v59 = vcvt.s32.f32 %v3768_v53 }
  0x27   : > { %4607 = vmatprep.subr.msk.bf16.mxu0 %vm580_vm0, %v4789_v32  ;;  %402 = vst.msk [vmem:[#allocation2 + $0xe8] sm:$0xff] %vm372_vm1, %v360_v9  ;;  %4602 = vmatprep.subr.msk.bf16.mxu1 %vm580_vm0, %v4796_v35  ;;  %v509_v54 = vpack.c.bf16 %v478_v43, %v477_v42  ;;  %403 = vst.msk [vmem:[#allocation2 + $0xf0] sm:$0xff] %vm372_vm1, %v361_v8  ;;  %v1687_v58 = vpack.c.bf16 %v1656_v47, %v1655_v46  ;;  %v3773_v60 = vunpack.c.1.s8 %v4809_v45  ;;  %v479_v3 = vld [vmem:[#allocation2 + $0x51] sm:$0xff]  ;;  %v480_v4 = vld [vmem:[#allocation2 + $0x59] sm:$0xff] }
  0x28   : > { %404 = vst.msk [vmem:[#allocation2 + $0xf8] sm:$0xff] %vm372_vm1, %v362_v48  ;;  %405 = vst.msk [vmem:[#allocation2 + $0x100] sm:$0xff] %vm372_vm1, %v363_v52  ;;  %v366_v61 = vcvt.s32.f32 %v3769_v56  ;;  %v367_v62 = vcvt.s32.f32 %v3772_v57  ;;  %v3776_v63 = vunpack.c.2.s8 %v4809_v45  ;;  %v1657_v5 = vld [vmem:[#allocation2 + $0x63] sm:$0xff]  ;;  %v1658_v7 = vld [vmem:[#allocation2 + $0x6b] sm:$0xff]  ;;  %v510_v14 = vpack.c.bf16 %v480_v4, %v479_v3 }
  0x29   : > { %406 = vst.msk [vmem:[#allocation2 + $0x108] sm:$0xff] %vm372_vm1, %v364_v55  ;;  %407 = vst.msk [vmem:[#allocation2 + $0x110] sm:$0xff] %vm372_vm1, %v365_v59  ;;  %v368_v1 = vcvt.s32.f32 %v3773_v60  ;;  %v481_v10 = vld [vmem:[#allocation2 + $0x61] sm:$0xff]  ;;  %v482_v11 = vld [vmem:[#allocation2 + $0x69] sm:$0xff]  ;;  %v1688_v15 = vpack.c.bf16 %v1658_v7, %v1657_v5  ;;  %v2410_v57 = vsel %vm580_vm0, %v4789_v32, 0 }
  0x2a   : > { %408 = vst.msk [vmem:[#allocation2 + $0x118] sm:$0xff] %vm372_vm1, %v366_v61  ;;  %409 = vst.msk [vmem:[#allocation2 + $0x120] sm:$0xff] %vm372_vm1, %v367_v62  ;;  %v369_v6 = vcvt.s32.f32 %v3776_v63  ;;  %v1659_v12 = vld [vmem:[#allocation2 + $0x73] sm:$0xff]  ;;  %v1660_v13 = vld [vmem:[#allocation2 + $0x7b] sm:$0xff]  ;;  %v511_v16 = vpack.c.bf16 %v482_v11, %v481_v10 }
  0x2b   : > { %410 = vst.msk [vmem:[#allocation2 + $0x128] sm:$0xff] %vm372_vm1, %v368_v1  ;;  %v1689_v17 = vpack.c.bf16 %v1660_v13, %v1659_v12  ;;  %v483_v18 = vld [vmem:[#allocation2 + $0x71] sm:$0xff]  ;;  %v484_v19 = vld [vmem:[#allocation2 + $0x79] sm:$0xff]  ;;  %v1661_v20 = vld [vmem:[#allocation2 + $0x83] sm:$0xff] }
  0x2c   : > { %3956 = vmatmul.mubr.msk.bf16.gmra.mrb[4].mxu1 %vm372_vm1, %v508_v50  ;;  %4108 = vmatmul.mubr.msk.bf16.gmra.mrb[4].mxu0 %vm372_vm1, %v1686_v51  ;;  %411 = vst.msk [vmem:[#allocation2 + $0x130] sm:$0xff] %vm372_vm1, %v369_v6  ;;  %v1662_v21 = vld [vmem:[#allocation2 + $0x8b] sm:$0xff]  ;;  %v485_v22 = vld [vmem:[#allocation2 + $0x81] sm:$0xff]  ;;  %v1663_v24 = vld [vmem:[#allocation2 + $0x93] sm:$0xff]  ;;  %v512_v26 = vpack.c.bf16 %v484_v19, %v483_v18  ;;  %v3777_v51 = vunpack.c.3.s8 %v4809_v45 }
  0x2d   : > { %3959 = vmatprep.mubr.msk.bf16.mxu1 %vm372_vm1, %v509_v54  ;;  %4111 = vmatprep.mubr.msk.bf16.mxu0 %vm372_vm1, %v1687_v58  ;;  %v486_v23 = vld [vmem:[#allocation2 + $0x89] sm:$0xff]  ;;  %v1664_v25 = vld [vmem:[#allocation2 + $0x9b] sm:$0xff]  ;;  %v1690_v27 = vpack.c.bf16 %v1662_v21, %v1661_v20  ;;  %v487_v30 = vld [vmem:[#allocation2 + $0x91] sm:$0xff] }
  0x2e   : > { %v513_v28 = vpack.c.bf16 %v486_v23, %v485_v22  ;;  %v1691_v29 = vpack.c.bf16 %v1664_v25, %v1663_v24  ;;  %v488_v31 = vld [vmem:[#allocation2 + $0x99] sm:$0xff]  ;;  %v1665_v33 = vld [vmem:[#allocation2 + $0xa3] sm:$0xff]  ;;  %v1666_v34 = vld [vmem:[#allocation2 + $0xab] sm:$0xff]  ;;  %v370_v55 = vcvt.s32.f32 %v3777_v51 }
  0x2f   : > { %v489_v36 = vld [vmem:[#allocation2 + $0xa1] sm:$0xff]  ;;  %v490_v37 = vld [vmem:[#allocation2 + $0xa9] sm:$0xff]  ;;  %v1973_v38 = vld [vmem:[#allocation2 + $0x14] sm:$0xff]  ;;  %v514_v40 = vpack.c.bf16 %v488_v31, %v487_v30  ;;  %v1692_v41 = vpack.c.bf16 %v1666_v34, %v1665_v33 }
  0x30   : > { %v1974_v39 = vld [vmem:[#allocation2 + $0x1c] sm:$0xff]  ;;  %v515_v42 = vpack.c.bf16 %v490_v37, %v489_v36  ;;  %v491_v9 = vld [vmem:[#allocation2 + $0xb1] sm:$0xff]  ;;  %v1975_v46 = vld [vmem:[#allocation2 + $0x24] sm:$0xff]  ;;  %412 = vst.msk [vmem:[#allocation2 + $0x138] sm:$0xff] %vm372_vm1, %v370_v55 }
  0x31   : > { %v2009_v43 = vpack.c.bf16 %v1974_v39, %v1973_v38  ;;  %v492_v44 = vld [vmem:[#allocation2 + $0xb9] sm:$0xff]  ;;  %v1976_v47 = vld [vmem:[#allocation2 + $0x2c] sm:$0xff]  ;;  %v493_v8 = vld [vmem:[#allocation2 + $0xc1] sm:$0xff] }
  0x32   : > { %v494_v48 = vld [vmem:[#allocation2 + $0xc9] sm:$0xff]  ;;  %v1977_v49 = vld [vmem:[#allocation2 + $0x34] sm:$0xff]  ;;  %v1978_v50 = vld [vmem:[#allocation2 + $0x3c] sm:$0xff]  ;;  %v516_v52 = vpack.c.bf16 %v492_v44, %v491_v9  ;;  %v4850_v53 = vpack.c.bf16 %v1976_v47, %v1975_v46 }
  0x33   : > { %v517_v54 = vpack.c.bf16 %v494_v48, %v493_v8  ;;  %v4852_v56 = vpack.c.bf16 %v1978_v50, %v1977_v49  ;;  %v4861_v58 = vld [vmem:[%s5358_s2 + $0xe] sm:$0x3]  ;;  %v495_v45 = vld [vmem:[#allocation2 + $0xd1] sm:$0xff]  ;;  %v496_v59 = vld [vmem:[#allocation2 + $0xd9] sm:$0xff]  ;;  %v1106_v49 = vsel %vm580_vm0, %v4796_v35, 0 }
  0x34   : > { %3960 = vmatmul.mubr.msk.bf16.gmra.mrb[8].mxu1 %vm372_vm1, %v510_v14  ;;  %4112 = vmatmul.mubr.msk.bf16.gmra.mrb[8].mxu0 %vm372_vm1, %v1688_v15  ;;  %v1979_v60 = vld [vmem:[#allocation2 + $0x44] sm:$0xff]  ;;  %v1980_v32 = vld [vmem:[#allocation2 + $0x4c] sm:$0xff]  ;;  %v1981_v63 = vld [vmem:[#allocation2 + $0x54] sm:$0xff]  ;;  %v518_v3 = vpack.c.bf16 %v496_v59, %v495_v45 }
  0x35   : > { %3963 = vmatprep.mubr.msk.bf16.mxu1 %vm372_vm1, %v511_v16  ;;  %4115 = vmatprep.mubr.msk.bf16.mxu0 %vm372_vm1, %v1689_v17  ;;  %v497_v61 = vld [vmem:[#allocation2 + $0xe1] sm:$0xff]  ;;  %v498_v62 = vld [vmem:[#allocation2 + $0xe9] sm:$0xff]  ;;  %v4870_v4 = vpack.c.bf16 %v1980_v32, %v1979_v60  ;;  %v499_v12 = vld [vmem:[#allocation2 + $0xf1] sm:$0xff] }
  0x36   : > { %v1982_v1 = vld [vmem:[#allocation2 + $0x5c] sm:$0xff]  ;;  %v519_v5 = vpack.c.bf16 %v498_v62, %v497_v61  ;;  %v289_v6 = vld [vmem:[%s4737_s5 + $0x50] sm:$0x3]  ;;  %v1983_v14 = vld [vmem:[#allocation2 + $0x64] sm:$0xff] }
  0x37   : > { %v4873_v7 = vpack.c.bf16 %v1982_v1, %v1981_v63  ;;  %v330_v10 = vunpack.c.0.s8 %v289_v6  ;;  %v500_v13 = vld [vmem:[#allocation2 + $0xf9] sm:$0xff]  ;;  %v1984_v15 = vld [vmem:[#allocation2 + $0x6c] sm:$0xff]  ;;  %v501_v16 = vld [vmem:[#allocation2 + $0x101] sm:$0xff] }
  0x38   : > { %v502_v17 = vld [vmem:[#allocation2 + $0x109] sm:$0xff]  ;;  %v1985_v18 = vld [vmem:[#allocation2 + $0x74] sm:$0xff]  ;;  %v1986_v19 = vld [vmem:[#allocation2 + $0x7c] sm:$0xff]  ;;  %v520_v20 = vpack.c.bf16 %v500_v13, %v499_v12  ;;  %v4882_v21 = vpack.c.bf16 %v1984_v15, %v1983_v14 }
  0x39   : > { %v371_v11 = vcvt.s32.f32 %v330_v10  ;;  %v521_v22 = vpack.c.bf16 %v502_v17, %v501_v16  ;;  %v4884_v23 = vpack.c.bf16 %v1986_v19, %v1985_v18  ;;  %v503_v24 = vld [vmem:[#allocation2 + $0x111] sm:$0xff]  ;;  %v504_v25 = vld [vmem:[#allocation2 + $0x119] sm:$0xff]  ;;  %v4912_v50 = vld [vmem:[%s5358_s2 + $0x6] sm:$0x3] }
  0x3a   : > { %v1989_v30 = vld [vmem:[#allocation2 + $0x94] sm:$0xff]  ;;  %v1990_v31 = vld [vmem:[#allocation2 + $0x9c] sm:$0xff]  ;;  %v522_v33 = vpack.c.bf16 %v504_v25, %v503_v24  ;;  %v1996_v35 = vld [vmem:[#allocation2 + $0xcc] sm:$0xff] }
  0x3b   : > { %413 = vst.msk [vmem:[#allocation2 + $0x140] sm:$0xff] %vm372_vm1, %v371_v11  ;;  %v4894_v37 = vpack.c.bf16 %v1990_v31, %v1989_v30  ;;  %v416_v38 = vld [vmem:[#allocation2 + $0x10] sm:$0xff]  ;;  %v417_v39 = vld [vmem:[#allocation2 + $0x18] sm:$0xff]  ;;  %v422_v55 = vld [vmem:[#allocation2 + $0x40] sm:$0xff] }
  0x3c   : > { %3964 = vmatmul.mubr.msk.bf16.gmra.mrb[12].mxu1 %vm372_vm1, %v512_v26  ;;  %4116 = vmatmul.mubr.msk.bf16.gmra.mrb[12].mxu0 %vm372_vm1, %v1690_v27  ;;  %v1987_v26 = vld [vmem:[#allocation2 + $0x84] sm:$0xff]  ;;  %v1988_v27 = vld [vmem:[#allocation2 + $0x8c] sm:$0xff]  ;;  %v1993_v9 = vld [vmem:[#allocation2 + $0xb4] sm:$0xff]  ;;  %v451_v46 = vpack.c.bf16 %v417_v39, %v416_v38 }
  0x3d   : > { %3967 = vmatprep.mubr.msk.bf16.mxu1 %vm372_vm1, %v513_v28  ;;  %4119 = vmatprep.mubr.msk.bf16.mxu0 %vm372_vm1, %v1691_v29  ;;  %v414_v28 = vld [vmem:[#allocation2] sm:$0xff]  ;;  %v415_v29 = vld [vmem:[#allocation2 + $0x8] sm:$0xff]  ;;  %v4892_v34 = vpack.c.bf16 %v1988_v27, %v1987_v26  ;;  %v420_v51 = vld [vmem:[#allocation2 + $0x30] sm:$0xff] }
  0x3e   : > { %v450_v36 = vpack.c.bf16 %v415_v29, %v414_v28  ;;  %v1994_v44 = vld [vmem:[#allocation2 + $0xbc] sm:$0xff]  ;;  %v1997_v45 = vld [vmem:[#allocation2 + $0xd4] sm:$0xff]  ;;  %v427_v10 = vld [vmem:[#allocation2 + $0x68] sm:$0xff] }
  0x3f   : > { %v4904_v48 = vpack.c.bf16 %v1994_v44, %v1993_v9  ;;  %v1998_v59 = vld [vmem:[#allocation2 + $0xdc] sm:$0xff]  ;;  %v424_v63 = vld [vmem:[#allocation2 + $0x50] sm:$0xff]  ;;  %v2003_v19 = vld [vmem:[#allocation2 + $0x104] sm:$0xff] }
  0x40   : > { %v4923_v62 = vpack.c.bf16 %v1998_v59, %v1997_v45  ;;  %v425_v1 = vld [vmem:[#allocation2 + $0x58] sm:$0xff]  ;;  %v426_v6 = vld [vmem:[#allocation2 + $0x60] sm:$0xff]  ;;  %v428_v17 = vld [vmem:[#allocation2 + $0x70] sm:$0xff] }
  0x41   : > { %v2001_v11 = vld [vmem:[#allocation2 + $0xf4] sm:$0xff]  ;;  %v2002_v12 = vld [vmem:[#allocation2 + $0xfc] sm:$0xff]  ;;  %v455_v13 = vpack.c.bf16 %v425_v1, %v424_v63  ;;  %v456_v15 = vpack.c.bf16 %v427_v10, %v426_v6  ;;  %v431_v24 = vld [vmem:[#allocation2 + $0x88] sm:$0xff] }
  0x42   : > { %v4933_v16 = vpack.c.bf16 %v2002_v12, %v2001_v11  ;;  %v429_v18 = vld [vmem:[#allocation2 + $0x78] sm:$0xff]  ;;  %v432_v31 = vld [vmem:[#allocation2 + $0x90] sm:$0xff]  ;;  %v434_v39 = vld [vmem:[#allocation2 + $0xa0] sm:$0xff] }
  0x43   : > { %v2005_v25 = vld [vmem:[#allocation2 + $0x114] sm:$0xff]  ;;  %v2006_v26 = vld [vmem:[#allocation2 + $0x11c] sm:$0xff]  ;;  %v457_v27 = vpack.c.bf16 %v429_v18, %v428_v17  ;;  %v2008_v38 = vld [vmem:[#allocation2 + $0x12c] sm:$0xff] }
  0x44   : > { %3968 = vmatmul.mubr.msk.bf16.gmra.mrb[16].mxu1 %vm372_vm1, %v514_v40  ;;  %4120 = vmatmul.mubr.msk.bf16.gmra.mrb[16].mxu0 %vm372_vm1, %v1692_v41  ;;  %v1991_v40 = vld [vmem:[#allocation2 + $0xa4] sm:$0xff]  ;;  %v1992_v41 = vld [vmem:[#allocation2 + $0xac] sm:$0xff]  ;;  %v4943_v30 = vpack.c.bf16 %v2006_v26, %v2005_v25  ;;  %v437_v44 = vld [vmem:[#allocation2 + $0xb8] sm:$0xff] }
  0x45   : > { %3971 = vmatprep.mubr.msk.bf16.mxu1 %vm372_vm1, %v515_v42  ;;  %4141 = vmatprep.mubr.msk.bf16.mxu0 %vm372_vm1, %v2009_v43  ;;  %v418_v42 = vld [vmem:[#allocation2 + $0x20] sm:$0xff]  ;;  %v419_v43 = vld [vmem:[#allocation2 + $0x28] sm:$0xff]  ;;  %v4902_v47 = vpack.c.bf16 %v1992_v41, %v1991_v40  ;;  %v436_v9 = vld [vmem:[#allocation2 + $0xb0] sm:$0xff] }
  0x46   : > { %v452_v8 = vpack.c.bf16 %v419_v43, %v418_v42  ;;  %v435_v40 = vld [vmem:[#allocation2 + $0xa8] sm:$0xff]  ;;  %v445_v59 = vld [vmem:[#allocation2 + $0xf8] sm:$0xff]  ;;  %v448_v1 = vld [vmem:[#allocation2 + $0x110] sm:$0xff] }
  0x47   : > { %v460_v43 = vpack.c.bf16 %v435_v40, %v434_v39  ;;  %v997_v10 = vld [vmem:[#allocation2 + $0x12] sm:$0xff]  ;;  %v999_v11 = vld [vmem:[#allocation2 + $0x22] sm:$0xff]  ;;  %v1000_v12 = vld [vmem:[#allocation2 + $0x2a] sm:$0xff] }
  0x48   : > { %v1003_v17 = vld [vmem:[#allocation2 + $0x42] sm:$0xff]  ;;  %v1004_v18 = vld [vmem:[#allocation2 + $0x4a] sm:$0xff]  ;;  %v1010_v25 = vld [vmem:[#allocation2 + $0x7a] sm:$0xff] }
  0x49   : > { %v1012_v26 = vld [vmem:[#allocation2 + $0x8a] sm:$0xff] }
  0x4a   : > { %v2625_v39 = vld [vmem:[#allocation2 + $0x25] sm:$0xff]  ;;  %v2626_v40 = vld [vmem:[#allocation2 + $0x2d] sm:$0xff] }
  0x4c   : > { %3972 = vmatmul.mubr.msk.bf16.gmra.mrb[20].mxu1 %vm372_vm1, %v516_v52  ;;  %4142 = vmatmul.mubr.msk.bf16.vlgmr.msra.gmra.mrb[0].mxu0 %vm372_vm1, %v4850_v53  ;;  %v421_v52 = vld [vmem:[#allocation2 + $0x38] sm:$0xff] }
  0x4d   : > { %3975 = vmatprep.mubr.msk.bf16.mxu1 %vm372_vm1, %v517_v54  ;;  %4178 = vmatpush3.bf16.msra.mxu0 %v2410_v57  ;;  %v1995_v54 = vld [vmem:[#allocation2 + $0xc4] sm:$0xff]  ;;  %v453_v60 = vpack.c.bf16 %v421_v52, %v420_v51  ;;  %v2736_v52 = vsel %vm580_vm0, %v4861_v58, 0 }
  0x4e   : > { %4145 = vmatprep.mubr.msk.bf16.mxu0 %vm372_vm1, %v4852_v56  ;;  %4608 = vmatprep.subr.msk.bf16.mxu0 %vm580_vm0, %v4861_v58  ;;  %v423_v57 = vld [vmem:[#allocation2 + $0x48] sm:$0xff]  ;;  %v4921_v32 = vpack.c.bf16 %v1996_v35, %v1995_v54  ;;  %v4965_v54 = vld [vmem:[%s5358_s2 + $0x10] sm:$0x3]  ;;  %v441_v35 = vld [vmem:[#allocation2 + $0xd8] sm:$0xff] }
  0x4f   : > { %v454_v61 = vpack.c.bf16 %v423_v57, %v422_v55  ;;  %v442_v55 = vld [vmem:[#allocation2 + $0xe0] sm:$0xff]  ;;  %v443_v58 = vld [vmem:[#allocation2 + $0xe8] sm:$0xff] }
  0x50   : > { %v464_v45 = vpack.c.bf16 %v443_v58, %v442_v55 }
  0x54   : > { %3976 = vmatmul.mubr.msk.bf16.gmra.mrb[24].mxu1 %vm372_vm1, %v518_v3  ;;  %4146 = vmatmul.mubr.msk.bf16.gmra.mrb[4].mxu0 %vm372_vm1, %v4870_v4  ;;  %v1999_v3 = vld [vmem:[#allocation2 + $0xe4] sm:$0xff] }
  0x55   : > { %3979 = vmatprep.mubr.msk.bf16.mxu1 %vm372_vm1, %v519_v5  ;;  %4149 = vmatprep.mubr.msk.bf16.mxu0 %vm372_vm1, %v4873_v7  ;;  %v2000_v5 = vld [vmem:[#allocation2 + $0xec] sm:$0xff] }
  0x56   : > { %v4931_v14 = vpack.c.bf16 %v2000_v5, %v1999_v3  ;;  %v995_v3 = vld [vmem:[#allocation2 + $0x2] sm:$0xff]  ;;  %v996_v5 = vld [vmem:[#allocation2 + $0xa] sm:$0xff] }
  0x5c   : > { %3980 = vmatmul.mubr.msk.bf16.gmra.mrb[28].mxu1 %vm372_vm1, %v520_v20  ;;  %4150 = vmatmul.mubr.msk.bf16.gmra.mrb[8].mxu0 %vm372_vm1, %v4882_v21  ;;  %v2004_v20 = vld [vmem:[#allocation2 + $0x10c] sm:$0xff] }
  0x5d   : > { %3983 = vmatprep.mubr.msk.bf16.mxu1 %vm372_vm1, %v521_v22  ;;  %4153 = vmatprep.mubr.msk.bf16.mxu0 %vm372_vm1, %v4884_v23  ;;  %v430_v22 = vld [vmem:[#allocation2 + $0x80] sm:$0xff]  ;;  %v4941_v28 = vpack.c.bf16 %v2004_v20, %v2003_v19  ;;  %v5010_v19 = vpack.c.bf16 %v1004_v18, %v1003_v17 }
  0x5e   : > { %v458_v29 = vpack.c.bf16 %v431_v24, %v430_v22  ;;  %v1007_v20 = vld [vmem:[#allocation2 + $0x62] sm:$0xff] }
  0x64   : > { %3984 = vmatmul.mubr.msk.bf16.gmra.mrb[32].mxu1 %vm372_vm1, %v522_v33  ;;  %4154 = vmatmul.mubr.msk.bf16.gmra.mrb[12].mxu0 %vm372_vm1, %v4892_v34  ;;  %v433_v33 = vld [vmem:[#allocation2 + $0x98] sm:$0xff] }
  0x65   : > { %3989 = vmatprep.mubr.msk.bf16.mxu1 %vm372_vm1, %v450_v36  ;;  %4157 = vmatprep.mubr.msk.bf16.mxu0 %vm372_vm1, %v4894_v37  ;;  %v2007_v36 = vld [vmem:[#allocation2 + $0x124] sm:$0xff]  ;;  %v459_v41 = vpack.c.bf16 %v433_v33, %v432_v31  ;;  %v1014_v31 = vld [vmem:[#allocation2 + $0x9a] sm:$0xff] }
  0x66   : > { %v4951_v42 = vpack.c.bf16 %v2008_v38, %v2007_v36  ;;  %v2333_v33 = vld [vmem:[#allocation2 + $0x134] sm:$0xff]  ;;  %v1015_v36 = vld [vmem:[#allocation2 + $0xa2] sm:$0xff]  ;;  %v1016_v38 = vld [vmem:[#allocation2 + $0xaa] sm:$0xff] }
  0x6c   : > { %3990 = vmatmul.mubr.msk.bf16.vlgmr.msra.gmra.mrb[0].mxu1 %vm372_vm1, %v451_v46  ;;  %4158 = vmatmul.mubr.msk.bf16.gmra.mrb[16].mxu0 %vm372_vm1, %v4902_v47  ;;  %v438_v46 = vld [vmem:[#allocation2 + $0xc0] sm:$0xff] }
  0x6d   : > { %3993 = vmatprep.mubr.msk.bf16.mxu1 %vm372_vm1, %v452_v8  ;;  %4161 = vmatprep.mubr.msk.bf16.mxu0 %vm372_vm1, %v4904_v48  ;;  %v439_v8 = vld [vmem:[#allocation2 + $0xc8] sm:$0xff] }
  0x6e   : > { %4026 = vmatpush3.bf16.msra.mxu1 %v1106_v49  ;;  %v461_v49 = vpack.c.bf16 %v437_v44, %v436_v9  ;;  %v462_v51 = vpack.c.bf16 %v439_v8, %v438_v46  ;;  %v5046_v9 = vpack.c.bf16 %v1016_v38, %v1015_v36  ;;  %v1018_v44 = vld [vmem:[#allocation2 + $0xba] sm:$0xff]  ;;  %v2645_v38 = vld [vmem:[#allocation2 + $0xc5] sm:$0xff] }
  0x6f   : > { %4603 = vmatprep.subr.msk.bf16.mxu1 %vm580_vm0, %v4912_v50  ;;  %v2627_v46 = vld [vmem:[#allocation2 + $0x35] sm:$0xff]  ;;  %v2628_v8 = vld [vmem:[#allocation2 + $0x3d] sm:$0xff] }
  0x70   : > { %v2662_v55 = vpack.c.bf16 %v2628_v8, %v2627_v46  ;;  %v2644_v36 = vld [vmem:[#allocation2 + $0xbd] sm:$0xff] }
  0x74   : > { %3994 = vmatmul.mubr.msk.bf16.gmra.mrb[4].mxu1 %vm372_vm1, %v453_v60  ;;  %4162 = vmatmul.mubr.msk.bf16.gmra.mrb[20].mxu0 %vm372_vm1, %v4921_v32  ;;  %v447_v60 = vld [vmem:[#allocation2 + $0x108] sm:$0xff] }
  0x75   : > { %3997 = vmatprep.mubr.msk.bf16.mxu1 %vm372_vm1, %v454_v61  ;;  %4165 = vmatprep.mubr.msk.bf16.mxu0 %vm372_vm1, %v4923_v62 }
  0x7c   : > { %3998 = vmatmul.mubr.msk.bf16.gmra.mrb[8].mxu1 %vm372_vm1, %v455_v13  ;;  %4166 = vmatmul.mubr.msk.bf16.gmra.mrb[24].mxu0 %vm372_vm1, %v4931_v14 }
  0x7d   : > { %4001 = vmatprep.mubr.msk.bf16.mxu1 %vm372_vm1, %v456_v15  ;;  %4169 = vmatprep.mubr.msk.bf16.mxu0 %vm372_vm1, %v4933_v16  ;;  %v1432_v15 = vsel %vm580_vm0, %v4912_v50, 0 }
  0x84   : > { %4002 = vmatmul.mubr.msk.bf16.gmra.mrb[12].mxu1 %vm372_vm1, %v457_v27  ;;  %4170 = vmatmul.mubr.msk.bf16.gmra.mrb[28].mxu0 %vm372_vm1, %v4941_v28 }
  0x85   : > { %4005 = vmatprep.mubr.msk.bf16.mxu1 %vm372_vm1, %v458_v29  ;;  %4173 = vmatprep.mubr.msk.bf16.mxu0 %vm372_vm1, %v4943_v30 }
  0x8c   : > { %4006 = vmatmul.mubr.msk.bf16.gmra.mrb[16].mxu1 %vm372_vm1, %v459_v41  ;;  %4174 = vmatmul.mubr.msk.bf16.gmra.mrb[32].mxu0 %vm372_vm1, %v4951_v42 }
  0x8d   : > { %4009 = vmatprep.mubr.msk.bf16.mxu1 %vm372_vm1, %v460_v43  ;;  %4179 = vmatprep.mubr.msk.bf16.mxu0 %vm372_vm1, %v4850_v53  ;;  %v440_v53 = vld [vmem:[#allocation2 + $0xd0] sm:$0xff] }
  0x8e   : > { %v463_v57 = vpack.c.bf16 %v441_v35, %v440_v53  ;;  %v2630_v53 = vld [vmem:[#allocation2 + $0x4d] sm:$0xff] }
  0x94   : > { %4010 = vmatmul.mubr.msk.bf16.gmra.mrb[20].mxu1 %vm372_vm1, %v461_v49  ;;  %4180 = vmatmul.mubr.msk.bf16.vlgmr.msra.gmra.mrb[0].mxu0 %vm372_vm1, %v4852_v56  ;;  %v444_v56 = vld [vmem:[#allocation2 + $0xf0] sm:$0xff]  ;;  %v1019_v49 = vld [vmem:[#allocation2 + $0xc2] sm:$0xff] }
  0x95   : > { %4013 = vmatprep.mubr.msk.bf16.mxu1 %vm372_vm1, %v462_v51  ;;  %4216 = vmatpush3.bf16.msra.mxu0 %v2736_v52  ;;  %v465_v61 = vpack.c.bf16 %v445_v59, %v444_v56  ;;  %v1020_v51 = vld [vmem:[#allocation2 + $0xca] sm:$0xff]  ;;  %v1021_v56 = vld [vmem:[#allocation2 + $0xd2] sm:$0xff]  ;;  %v1022_v59 = vld [vmem:[#allocation2 + $0xda] sm:$0xff] }
  0x96   : > { %4183 = vmatprep.mubr.msk.bf16.mxu0 %vm372_vm1, %v4870_v4  ;;  %4609 = vmatprep.subr.msk.bf16.mxu0 %vm580_vm0, %v4965_v54  ;;  %v446_v4 = vld [vmem:[#allocation2 + $0x100] sm:$0xff]  ;;  %v5056_v58 = vpack.c.bf16 %v1020_v51, %v1019_v49 }
  0x97   : > { %v466_v63 = vpack.c.bf16 %v447_v60, %v446_v4  ;;  %v2629_v52 = vld [vmem:[#allocation2 + $0x45] sm:$0xff]  ;;  %v2631_v4 = vld [vmem:[#allocation2 + $0x55] sm:$0xff]  ;;  %v2632_v60 = vld [vmem:[#allocation2 + $0x5d] sm:$0xff] }
  0x98   : > { %v2653_v49 = vld [vmem:[#allocation2 + $0x105] sm:$0xff] }
  0x9c   : > { %4014 = vmatmul.mubr.msk.bf16.gmra.mrb[24].mxu1 %vm372_vm1, %v463_v57  ;;  %4184 = vmatmul.mubr.msk.bf16.gmra.mrb[4].mxu0 %vm372_vm1, %v4873_v7  ;;  %v449_v7 = vld [vmem:[#allocation2 + $0x118] sm:$0xff]  ;;  %v2663_v57 = vpack.c.bf16 %v2630_v53, %v2629_v52  ;;  %v2657_v53 = vld [vmem:[#allocation2 + $0x125] sm:$0xff] }
  0x9d   : > { %4017 = vmatprep.mubr.msk.bf16.mxu1 %vm372_vm1, %v464_v45  ;;  %4187 = vmatprep.mubr.msk.bf16.mxu0 %vm372_vm1, %v4882_v21  ;;  %v467_v6 = vpack.c.bf16 %v449_v7, %v448_v1  ;;  %v1031_v21 = vpack.c.bf16 %v996_v5, %v995_v3  ;;  %v3062_v45 = vsel %vm580_vm0, %v4965_v54, 0  ;;  %v2633_v1 = vld [vmem:[#allocation2 + $0x65] sm:$0xff]  ;;  %v2634_v7 = vld [vmem:[#allocation2 + $0x6d] sm:$0xff]  ;;  %v5066_v54 = vpack.c.bf16 %v1022_v59, %v1021_v56 }
  0x9e   : > { %v2664_v3 = vpack.c.bf16 %v2632_v60, %v2631_v4  ;;  %v2951_v56 = vld [vmem:[#allocation2 + $0x26] sm:$0xff]  ;;  %v2952_v59 = vld [vmem:[#allocation2 + $0x2e] sm:$0xff] }
  0x9f   : > { %v2987_v60 = vpack.c.bf16 %v2952_v59, %v2951_v56  ;;  %v2979_v56 = vld [vmem:[#allocation2 + $0x106] sm:$0xff]  ;;  %v2980_v59 = vld [vmem:[#allocation2 + $0x10e] sm:$0xff] }
  0xa4   : > { %4018 = vmatmul.mubr.msk.bf16.gmra.mrb[28].mxu1 %vm372_vm1, %v465_v61  ;;  %4188 = vmatmul.mubr.msk.bf16.gmra.mrb[8].mxu0 %vm372_vm1, %v4884_v23  ;;  %v998_v23 = vld [vmem:[#allocation2 + $0x1a] sm:$0xff]  ;;  %v1023_v61 = vld [vmem:[#allocation2 + $0xe2] sm:$0xff] }
  0xa5   : > { %4021 = vmatprep.mubr.msk.bf16.mxu1 %vm372_vm1, %v466_v63  ;;  %4191 = vmatprep.mubr.msk.bf16.mxu0 %vm372_vm1, %v4892_v34  ;;  %v4992_v13 = vpack.c.bf16 %v998_v23, %v997_v10  ;;  %v4994_v34 = vpack.c.bf16 %v1000_v12, %v999_v11  ;;  %v1024_v63 = vld [vmem:[#allocation2 + $0xea] sm:$0xff]  ;;  %v1026_v10 = vld [vmem:[#allocation2 + $0xfa] sm:$0xff]  ;;  %v1027_v12 = vld [vmem:[#allocation2 + $0x102] sm:$0xff] }
  0xa6   : > { %v5068_v5 = vpack.c.bf16 %v1024_v63, %v1023_v61  ;;  %v2635_v23 = vld [vmem:[#allocation2 + $0x75] sm:$0xff]  ;;  %v2636_v11 = vld [vmem:[#allocation2 + $0x7d] sm:$0xff]  ;;  %v2955_v61 = vld [vmem:[#allocation2 + $0x46] sm:$0xff] }
  0xa7   : > { %v2666_v18 = vpack.c.bf16 %v2636_v11, %v2635_v23  ;;  %v2956_v63 = vld [vmem:[#allocation2 + $0x4e] sm:$0xff]  ;;  %v2963_v23 = vld [vmem:[#allocation2 + $0x86] sm:$0xff] }
  0xa8   : > { %v2964_v11 = vld [vmem:[#allocation2 + $0x8e] sm:$0xff] }
  0xac   : > { %4022 = vmatmul.mubr.msk.bf16.gmra.mrb[32].mxu1 %vm372_vm1, %v467_v6  ;;  %4192 = vmatmul.mubr.msk.bf16.gmra.mrb[12].mxu0 %vm372_vm1, %v4894_v37  ;;  %v1001_v37 = vld [vmem:[#allocation2 + $0x32] sm:$0xff]  ;;  %v2665_v6 = vpack.c.bf16 %v2634_v7, %v2633_v1  ;;  %v2989_v7 = vpack.c.bf16 %v2956_v63, %v2955_v61  ;;  %v1681_v61 = vld [vmem:[#allocation2 + $0x123] sm:$0xff] }
  0xad   : > { %4027 = vmatprep.mubr.msk.bf16.mxu1 %vm372_vm1, %v1031_v21  ;;  %4195 = vmatprep.mubr.msk.bf16.mxu0 %vm372_vm1, %v4902_v47  ;;  %v1002_v47 = vld [vmem:[#allocation2 + $0x3a] sm:$0xff]  ;;  %v1025_v21 = vld [vmem:[#allocation2 + $0xf2] sm:$0xff] }
  0xae   : > { %v5008_v50 = vpack.c.bf16 %v1002_v47, %v1001_v37  ;;  %v2637_v37 = vld [vmem:[#allocation2 + $0x85] sm:$0xff]  ;;  %v2638_v47 = vld [vmem:[#allocation2 + $0x8d] sm:$0xff]  ;;  %v5076_v17 = vpack.c.bf16 %v1026_v10, %v1025_v21 }
  0xaf   : > { %v1682_v63 = vld [vmem:[#allocation2 + $0x12b] sm:$0xff] }
  0xb4   : > { %4028 = vmatmul.mubr.msk.bf16.vlgmr.msra.gmra.mrb[0].mxu1 %vm372_vm1, %v4992_v13  ;;  %4196 = vmatmul.mubr.msk.bf16.gmra.mrb[16].mxu0 %vm372_vm1, %v4904_v48  ;;  %v1005_v48 = vld [vmem:[#allocation2 + $0x52] sm:$0xff] }
  0xb5   : > { %4031 = vmatprep.mubr.msk.bf16.mxu1 %vm372_vm1, %v4994_v34  ;;  %4199 = vmatprep.mubr.msk.bf16.mxu0 %vm372_vm1, %v4921_v32  ;;  %v1006_v32 = vld [vmem:[#allocation2 + $0x5a] sm:$0xff] }
  0xb6   : > { %4064 = vmatpush3.bf16.msra.mxu1 %v1432_v15  ;;  %v5020_v22 = vpack.c.bf16 %v1006_v32, %v1005_v48  ;;  %v1028_v15 = vld [vmem:[#allocation2 + $0x10a] sm:$0xff]  ;;  %v2667_v32 = vpack.c.bf16 %v2638_v47, %v2637_v37  ;;  %v2965_v47 = vld [vmem:[#allocation2 + $0x96] sm:$0xff] }
  0xb7   : > { %4605 = vmatprep.subr.msk.bf16.mxu1 %vm580_vm0, %v4709_v0  ;;  %v1008_v0 = vld [vmem:[#allocation2 + $0x6a] sm:$0xff]  ;;  %v5078_v48 = vpack.c.bf16 %v1028_v15, %v1027_v12  ;;  %v2993_v15 = vpack.c.bf16 %v2964_v11, %v2963_v23 }
  0xb8   : > { %v5022_v24 = vpack.c.bf16 %v1008_v0, %v1007_v20  ;;  %v1029_v20 = vld [vmem:[#allocation2 + $0x112] sm:$0xff]  ;;  %v1030_v0 = vld [vmem:[#allocation2 + $0x11a] sm:$0xff]  ;;  %v1356_v37 = vld [vmem:[#allocation2 + $0x12a] sm:$0xff] }
  0xbc   : > { %4032 = vmatmul.mubr.msk.bf16.gmra.mrb[4].mxu1 %vm372_vm1, %v5008_v50  ;;  %4200 = vmatmul.mubr.msk.bf16.gmra.mrb[20].mxu0 %vm372_vm1, %v4923_v62  ;;  %v1009_v62 = vld [vmem:[#allocation2 + $0x72] sm:$0xff] }
  0xbd   : > { %4035 = vmatprep.mubr.msk.bf16.mxu1 %vm372_vm1, %v5010_v19  ;;  %4203 = vmatprep.mubr.msk.bf16.mxu0 %vm372_vm1, %v4931_v14  ;;  %v1011_v14 = vld [vmem:[#allocation2 + $0x82] sm:$0xff]  ;;  %v5032_v27 = vpack.c.bf16 %v1010_v25, %v1009_v62  ;;  %v2639_v62 = vld [vmem:[#allocation2 + $0x95] sm:$0xff] }
  0xbe   : > { %v5034_v29 = vpack.c.bf16 %v1012_v26, %v1011_v14  ;;  %v2640_v25 = vld [vmem:[#allocation2 + $0x9d] sm:$0xff]  ;;  %v2641_v14 = vld [vmem:[#allocation2 + $0xa5] sm:$0xff]  ;;  %v2642_v26 = vld [vmem:[#allocation2 + $0xad] sm:$0xff] }
  0xc4   : > { %4036 = vmatmul.mubr.msk.bf16.gmra.mrb[8].mxu1 %vm372_vm1, %v5020_v22  ;;  %4204 = vmatmul.mubr.msk.bf16.gmra.mrb[24].mxu0 %vm372_vm1, %v4933_v16  ;;  %v1013_v16 = vld [vmem:[#allocation2 + $0x92] sm:$0xff] }
  0xc5   : > { %4039 = vmatprep.mubr.msk.bf16.mxu1 %vm372_vm1, %v5022_v24  ;;  %4207 = vmatprep.mubr.msk.bf16.mxu0 %vm372_vm1, %v4941_v28  ;;  %v2334_v28 = vld [vmem:[#allocation2 + $0x13c] sm:$0xff]  ;;  %v5044_v41 = vpack.c.bf16 %v1014_v31, %v1013_v16  ;;  %v5086_v16 = vpack.c.bf16 %v1030_v0, %v1029_v20  ;;  %v2668_v31 = vpack.c.bf16 %v2640_v25, %v2639_v62  ;;  %v2967_v20 = vld [vmem:[#allocation2 + $0xa6] sm:$0xff]  ;;  %v2968_v0 = vld [vmem:[#allocation2 + $0xae] sm:$0xff] }
  0xc6   : > { %v2352_v43 = vpack.c.bf16 %v2334_v28, %v2333_v33  ;;  %v2669_v33 = vpack.c.bf16 %v2642_v26, %v2641_v14  ;;  %v2643_v28 = vld [vmem:[#allocation2 + $0xb5] sm:$0xff]  ;;  %v2995_v26 = vpack.c.bf16 %v2968_v0, %v2967_v20 }
  0xcc   : > { %4040 = vmatmul.mubr.msk.bf16.gmra.mrb[12].mxu1 %vm372_vm1, %v5032_v27  ;;  %4208 = vmatmul.mubr.msk.bf16.gmra.mrb[28].mxu0 %vm372_vm1, %v4943_v30  ;;  %v2661_v30 = vpack.c.bf16 %v2626_v40, %v2625_v39  ;;  %v2646_v39 = vld [vmem:[#allocation2 + $0xcd] sm:$0xff]  ;;  %v2670_v40 = vpack.c.bf16 %v2644_v36, %v2643_v28  ;;  %v1672_v36 = vld [vmem:[#allocation2 + $0xdb] sm:$0xff] }
  0xcd   : > { %4043 = vmatprep.mubr.msk.bf16.mxu1 %vm372_vm1, %v5034_v29  ;;  %4211 = vmatprep.mubr.msk.bf16.mxu0 %vm372_vm1, %v4951_v42  ;;  %v1017_v42 = vld [vmem:[#allocation2 + $0xb2] sm:$0xff] }
  0xce   : > { %v5054_v35 = vpack.c.bf16 %v1018_v44, %v1017_v42  ;;  %v2649_v42 = vld [vmem:[#allocation2 + $0xe5] sm:$0xff]  ;;  %v2650_v44 = vld [vmem:[#allocation2 + $0xed] sm:$0xff] }
  0xcf   : > { %v2673_v8 = vpack.c.bf16 %v2650_v44, %v2649_v42  ;;  %v1671_v28 = vld [vmem:[#allocation2 + $0xd3] sm:$0xff]  ;;  %v1673_v42 = vld [vmem:[#allocation2 + $0xe3] sm:$0xff]  ;;  %v1674_v44 = vld [vmem:[#allocation2 + $0xeb] sm:$0xff] }
  0xd4   : > { %4044 = vmatmul.mubr.msk.bf16.gmra.mrb[16].mxu1 %vm372_vm1, %v5044_v41  ;;  %4212 = vmatmul.mubr.msk.bf16.gmra.mrb[32].mxu0 %vm372_vm1, %v2352_v43  ;;  %v2671_v43 = vpack.c.bf16 %v2646_v39, %v2645_v38  ;;  %v2971_v38 = vld [vmem:[#allocation2 + $0xc6] sm:$0xff]  ;;  %v2972_v39 = vld [vmem:[#allocation2 + $0xce] sm:$0xff] }
  0xd5   : > { %4047 = vmatprep.mubr.msk.bf16.mxu1 %vm372_vm1, %v5046_v9  ;;  %4217 = vmatprep.mubr.msk.bf16.mxu0 %vm372_vm1, %v2661_v30  ;;  %v2648_v30 = vld [vmem:[#allocation2 + $0xdd] sm:$0xff] }
  0xdc   : > { %4048 = vmatmul.mubr.msk.bf16.gmra.mrb[20].mxu1 %vm372_vm1, %v5054_v35  ;;  %4218 = vmatmul.mubr.msk.bf16.vlgmr.msra.gmra.mrb[0].mxu0 %vm372_vm1, %v2662_v55  ;;  %v2658_v55 = vld [vmem:[#allocation2 + $0x12d] sm:$0xff] }
  0xdd   : > { %4051 = vmatprep.mubr.msk.bf16.mxu1 %vm372_vm1, %v5056_v58  ;;  %4254 = vmatpush3.bf16.msra.mxu0 %v3062_v45  ;;  %v2677_v45 = vpack.c.bf16 %v2658_v55, %v2657_v53  ;;  %v1677_v53 = vld [vmem:[#allocation2 + $0x103] sm:$0xff]  ;;  %v1678_v55 = vld [vmem:[#allocation2 + $0x10b] sm:$0xff] }
  0xde   : > { %4221 = vmatprep.mubr.msk.bf16.mxu0 %vm372_vm1, %v2663_v57 }
  0xe4   : > { %4052 = vmatmul.mubr.msk.bf16.gmra.mrb[24].mxu1 %vm372_vm1, %v5066_v54  ;;  %4222 = vmatmul.mubr.msk.bf16.gmra.mrb[4].mxu0 %vm372_vm1, %v2664_v3  ;;  %v2959_v3 = vld [vmem:[#allocation2 + $0x66] sm:$0xff] }
  0xe5   : > { %4055 = vmatprep.mubr.msk.bf16.mxu1 %vm372_vm1, %v5068_v5  ;;  %4225 = vmatprep.mubr.msk.bf16.mxu0 %vm372_vm1, %v2665_v6  ;;  %v2960_v6 = vld [vmem:[#allocation2 + $0x6e] sm:$0xff] }
  0xe6   : > { %v2991_v10 = vpack.c.bf16 %v2960_v6, %v2959_v3  ;;  %v1700_v3 = vpack.c.bf16 %v1682_v63, %v1681_v61 }
  0xec   : > { %4056 = vmatmul.mubr.msk.bf16.gmra.mrb[28].mxu1 %vm372_vm1, %v5076_v17  ;;  %4226 = vmatmul.mubr.msk.bf16.gmra.mrb[8].mxu0 %vm372_vm1, %v2666_v18  ;;  %v1667_v18 = vld [vmem:[#allocation2 + $0xb3] sm:$0xff] }
  0xed   : > { %4059 = vmatprep.mubr.msk.bf16.mxu1 %vm372_vm1, %v5078_v48  ;;  %4229 = vmatprep.mubr.msk.bf16.mxu0 %vm372_vm1, %v2667_v32  ;;  %v1668_v32 = vld [vmem:[#allocation2 + $0xbb] sm:$0xff] }
  0xee   : > { %v1693_v14 = vpack.c.bf16 %v1668_v32, %v1667_v18 }
  0xf4   : > { %4060 = vmatmul.mubr.msk.bf16.gmra.mrb[32].mxu1 %vm372_vm1, %v5086_v16  ;;  %4230 = vmatmul.mubr.msk.bf16.gmra.mrb[12].mxu0 %vm372_vm1, %v2668_v31  ;;  %v2969_v31 = vld [vmem:[#allocation2 + $0xb6] sm:$0xff] }
  0xf5   : > { %4065 = vmatprep.mubr.msk.bf16.mxu1 %vm372_vm1, %v4992_v13  ;;  %4233 = vmatprep.mubr.msk.bf16.mxu0 %vm372_vm1, %v2669_v33  ;;  %v2647_v13 = vld [vmem:[#allocation2 + $0xd5] sm:$0xff]  ;;  %v2970_v33 = vld [vmem:[#allocation2 + $0xbe] sm:$0xff] }
  0xf6   : > { %v2672_v46 = vpack.c.bf16 %v2648_v30, %v2647_v13  ;;  %v1695_v13 = vpack.c.bf16 %v1672_v36, %v1671_v28  ;;  %v2997_v30 = vpack.c.bf16 %v2972_v39, %v2971_v38  ;;  %v5182_v36 = vstv %s3277_s16 }
  0xfc   : > { %4066 = vmatmul.mubr.msk.bf16.vlgmr.msra.gmra.mrb[0].mxu1 %vm372_vm1, %v4994_v34  ;;  %4234 = vmatmul.mubr.msk.bf16.gmra.mrb[16].mxu0 %vm372_vm1, %v2670_v40  ;;  %v2651_v34 = vld [vmem:[#allocation2 + $0xf5] sm:$0xff] }
  0xfd   : > { %4069 = vmatprep.mubr.msk.bf16.mxu1 %vm372_vm1, %v5008_v50  ;;  %4237 = vmatprep.mubr.msk.bf16.mxu0 %vm372_vm1, %v2671_v43  ;;  %v2652_v50 = vld [vmem:[#allocation2 + $0xfd] sm:$0xff]  ;;  %v2996_v43 = vpack.c.bf16 %v2970_v33, %v2969_v31 }
  0xfe   : > { %4292 = vmatpush3.bf16.msra.mxu1 %v4719_v2  ;;  %v2654_v2 = vld [vmem:[#allocation2 + $0x10d] sm:$0xff]  ;;  %v2674_v51 = vpack.c.bf16 %v2652_v50, %v2651_v34  ;;  %v1676_v50 = vld [vmem:[#allocation2 + $0xfb] sm:$0xff] }
  0xff   : > { %v2675_v52 = vpack.c.bf16 %v2654_v2, %v2653_v49  ;;  %v1675_v34 = vld [vmem:[#allocation2 + $0xf3] sm:$0xff]  ;;  %v2975_v49 = vld [vmem:[#allocation2 + $0xe6] sm:$0xff] }
 0x100   : > { %v2976_v2 = vld [vmem:[#allocation2 + $0xee] sm:$0xff] }
 0x104   : > { %4070 = vmatmul.mubr.msk.bf16.gmra.mrb[4].mxu1 %vm372_vm1, %v5010_v19  ;;  %4238 = vmatmul.mubr.msk.bf16.gmra.mrb[20].mxu0 %vm372_vm1, %v2672_v46  ;;  %v2655_v19 = vld [vmem:[#allocation2 + $0x115] sm:$0xff] }
 0x105   : > { %4073 = vmatprep.mubr.msk.bf16.mxu1 %vm372_vm1, %v5020_v22  ;;  %4241 = vmatprep.mubr.msk.bf16.mxu0 %vm372_vm1, %v2673_v8  ;;  %v2656_v22 = vld [vmem:[#allocation2 + $0x11d] sm:$0xff] }
 0x106   : > { %v2676_v57 = vpack.c.bf16 %v2656_v22, %v2655_v19  ;;  %v2973_v46 = vld [vmem:[#allocation2 + $0xd6] sm:$0xff]  ;;  %v2974_v8 = vld [vmem:[#allocation2 + $0xde] sm:$0xff]  ;;  %v1697_v19 = vpack.c.bf16 %v1676_v50, %v1675_v34  ;;  %v2999_v22 = vpack.c.bf16 %v2976_v2, %v2975_v49 }
 0x10c   : > { %4074 = vmatmul.mubr.msk.bf16.gmra.mrb[8].mxu1 %vm372_vm1, %v5022_v24  ;;  %4242 = vmatmul.mubr.msk.bf16.gmra.mrb[24].mxu0 %vm372_vm1, %v2674_v51  ;;  %v2659_v24 = vld [vmem:[#allocation2 + $0x135] sm:$0xff]  ;;  %v1696_v51 = vpack.c.bf16 %v1674_v44, %v1673_v42 }
 0x10d   : > { %4077 = vmatprep.mubr.msk.bf16.mxu1 %vm372_vm1, %v5032_v27  ;;  %4245 = vmatprep.mubr.msk.bf16.mxu0 %vm372_vm1, %v2675_v52  ;;  %v2660_v27 = vld [vmem:[#allocation2 + $0x13d] sm:$0xff]  ;;  %v2998_v52 = vpack.c.bf16 %v2974_v8, %v2973_v46 }
 0x10e   : > { %v2678_v4 = vpack.c.bf16 %v2660_v27, %v2659_v24  ;;  %v1679_v24 = vld [vmem:[#allocation2 + $0x113] sm:$0xff]  ;;  %v1680_v27 = vld [vmem:[#allocation2 + $0x11b] sm:$0xff] }
 0x114   : > { %4078 = vmatmul.mubr.msk.bf16.gmra.mrb[12].mxu1 %vm372_vm1, %v5034_v29  ;;  %4246 = vmatmul.mubr.msk.bf16.gmra.mrb[28].mxu0 %vm372_vm1, %v2676_v57  ;;  %v2953_v29 = vld [vmem:[#allocation2 + $0x36] sm:$0xff] }
 0x115   : > { %4081 = vmatprep.mubr.msk.bf16.mxu1 %vm372_vm1, %v5044_v41  ;;  %4249 = vmatprep.mubr.msk.bf16.mxu0 %vm372_vm1, %v2677_v45  ;;  %v2954_v41 = vld [vmem:[#allocation2 + $0x3e] sm:$0xff]  ;;  %v2977_v57 = vld [vmem:[#allocation2 + $0xf6] sm:$0xff] }
 0x116   : > { %v2988_v1 = vpack.c.bf16 %v2954_v41, %v2953_v29  ;;  %v2978_v45 = vld [vmem:[#allocation2 + $0xfe] sm:$0xff]  ;;  %v1699_v29 = vpack.c.bf16 %v1680_v27, %v1679_v24  ;;  %v3001_v41 = vpack.c.bf16 %v2980_v59, %v2979_v56 }
 0x11c   : > { %4082 = vmatmul.mubr.msk.bf16.gmra.mrb[16].mxu1 %vm372_vm1, %v5046_v9  ;;  %4250 = vmatmul.mubr.msk.bf16.gmra.mrb[32].mxu0 %vm372_vm1, %v2678_v4  ;;  %v2957_v9 = vld [vmem:[#allocation2 + $0x56] sm:$0xff]  ;;  %v1698_v4 = vpack.c.bf16 %v1678_v55, %v1677_v53 }
 0x11d   : > { %4085 = vmatprep.mubr.msk.bf16.mxu1 %vm372_vm1, %v5054_v35  ;;  %4255 = vmatprep.mubr.msk.bf16.mxu0 %vm372_vm1, %v2987_v60  ;;  %v2958_v35 = vld [vmem:[#allocation2 + $0x5e] sm:$0xff]  ;;  %v3000_v60 = vpack.c.bf16 %v2978_v45, %v2977_v57 }
 0x11e   : > { %v2990_v21 = vpack.c.bf16 %v2958_v35, %v2957_v9  ;;  %v2983_v9 = vld [vmem:[#allocation2 + $0x126] sm:$0xff]  ;;  %v2984_v35 = vld [vmem:[#allocation2 + $0x12e] sm:$0xff] }
 0x124   : > { %4086 = vmatmul.mubr.msk.bf16.gmra.mrb[20].mxu1 %vm372_vm1, %v5056_v58  ;;  %4256 = vmatmul.mubr.msk.bf16.vlgmr.msra.gmra.mrb[0].mxu0 %vm372_vm1, %v2988_v1  ;;  %v2961_v58 = vld [vmem:[#allocation2 + $0x76] sm:$0xff] }
 0x125   : > { %4089 = vmatprep.mubr.msk.bf16.mxu1 %vm372_vm1, %v5066_v54  ;;  %4259 = vmatprep.mubr.msk.bf16.mxu0 %vm372_vm1, %v2989_v7  ;;  %v2962_v54 = vld [vmem:[#allocation2 + $0x7e] sm:$0xff]  ;;  %v2981_v1 = vld [vmem:[#allocation2 + $0x116] sm:$0xff] }
 0x126   : > { %v2992_v12 = vpack.c.bf16 %v2962_v54, %v2961_v58  ;;  %v2982_v7 = vld [vmem:[#allocation2 + $0x11e] sm:$0xff] }
 0x127   : > { %v3002_v6 = vpack.c.bf16 %v2982_v7, %v2981_v1  ;;  %v2986_v58 = vld [vmem:[#allocation2 + $0x13e] sm:$0xff] }
 0x12c   : > { %4090 = vmatmul.mubr.msk.bf16.gmra.mrb[24].mxu1 %vm372_vm1, %v5068_v5  ;;  %4260 = vmatmul.mubr.msk.bf16.gmra.mrb[4].mxu0 %vm372_vm1, %v2990_v21  ;;  %v1355_v5 = vld [vmem:[#allocation2 + $0x122] sm:$0xff]  ;;  %v3003_v21 = vpack.c.bf16 %v2984_v35, %v2983_v9 }
 0x12d   : > { %4093 = vmatprep.mubr.msk.bf16.mxu1 %vm372_vm1, %v5076_v17  ;;  %4263 = vmatprep.mubr.msk.bf16.mxu0 %vm372_vm1, %v2991_v10  ;;  %v2966_v17 = vld [vmem:[#allocation2 + $0x9e] sm:$0xff]  ;;  %v1374_v62 = vpack.c.bf16 %v1356_v37, %v1355_v5  ;;  %v2985_v10 = vld [vmem:[#allocation2 + $0x136] sm:$0xff] }
 0x12e   : > { %v2994_v25 = vpack.c.bf16 %v2966_v17, %v2965_v47  ;;  %v3004_v54 = vpack.c.bf16 %v2986_v58, %v2985_v10 }
 0x134   : > { %4094 = vmatmul.mubr.msk.bf16.gmra.mrb[28].mxu1 %vm372_vm1, %v5078_v48  ;;  %4264 = vmatmul.mubr.msk.bf16.gmra.mrb[8].mxu0 %vm372_vm1, %v2992_v12  ;;  %v1669_v48 = vld [vmem:[#allocation2 + $0xc3] sm:$0xff] }
 0x135   : > { %4097 = vmatprep.mubr.msk.bf16.mxu1 %vm372_vm1, %v5086_v16  ;;  %4267 = vmatprep.mubr.msk.bf16.mxu0 %vm372_vm1, %v2993_v15  ;;  %v1670_v16 = vld [vmem:[#allocation2 + $0xcb] sm:$0xff] }
 0x136   : > { %v1694_v40 = vpack.c.bf16 %v1670_v16, %v1669_v48 }
 0x13c   : > { %4098 = vmatmul.mubr.msk.bf16.gmra.mrb[32].mxu1 %vm372_vm1, %v1374_v62  ;;  %4268 = vmatmul.mubr.msk.bf16.gmra.mrb[12].mxu0 %vm372_vm1, %v2994_v25 }
 0x13d   : > { %4123 = vmatprep.mubr.msk.bf16.mxu1 %vm372_vm1, %v1693_v14  ;;  %4271 = vmatprep.mubr.msk.bf16.mxu0 %vm372_vm1, %v2995_v26 }
 0x144   : > { %4124 = vmatmul.mubr.msk.bf16.vlgmr.msra.gmra.mrb[20].mxu1 %vm372_vm1, %v1694_v40  ;;  %4272 = vmatmul.mubr.msk.bf16.gmra.mrb[16].mxu0 %vm372_vm1, %v2996_v43  ;;  %v5187_v40 = vld [vmem:[%s5359_s3] ss:$0 sm:$0xff] }
 0x145   : > { %4127 = vmatprep.mubr.msk.bf16.mxu1 %vm372_vm1, %v1695_v13  ;;  %4275 = vmatprep.mubr.msk.bf16.mxu0 %vm372_vm1, %v2997_v30 }
 0x14c   : > { %4128 = vmatmul.mubr.msk.bf16.gmra.mrb[24].mxu1 %vm372_vm1, %v1696_v51  ;;  %4276 = vmatmul.mubr.msk.bf16.gmra.mrb[20].mxu0 %vm372_vm1, %v2998_v52 }
 0x14d   : > { %4131 = vmatprep.mubr.msk.bf16.mxu1 %vm372_vm1, %v1697_v19  ;;  %4279 = vmatprep.mubr.msk.bf16.mxu0 %vm372_vm1, %v2999_v22 }
 0x154   : > { %4132 = vmatmul.mubr.msk.bf16.gmra.mrb[28].mxu1 %vm372_vm1, %v1698_v4  ;;  %4280 = vmatmul.mubr.msk.bf16.gmra.mrb[24].mxu0 %vm372_vm1, %v3000_v60 }
 0x155   : > { %4135 = vmatprep.mubr.msk.bf16.mxu1 %vm372_vm1, %v1699_v29  ;;  %4283 = vmatprep.mubr.msk.bf16.mxu0 %vm372_vm1, %v3001_v41 }
 0x15c   : > { %4136 = vmatmul.mubr.msk.bf16.gmra.mrb[32].mxu1 %vm372_vm1, %v1700_v3  ;;  %4284 = vmatmul.mubr.msk.bf16.gmra.mrb[28].mxu0 %vm372_vm1, %v3002_v6 }
 0x15d   : > { %4287 = vmatprep.mubr.msk.bf16.mxu0 %vm372_vm1, %v3003_v21 }
 0x164   : > { %4288 = vmatmul.mubr.msk.bf16.gmra.mrb[32].mxu0 %vm372_vm1, %v3004_v54 }
 0x1cf   : > { %v4067_v23 = vpop.f32.mrb[0].mxu1 }
 0x1d0   : > { %v1468_v11 = vpop.f32.mrb[1].mxu1 }
 0x1d1   : > { %v4068_v12 = vpop.f32.mrb[2].mxu1 }
 0x1d2   : > { %v1471_v15 = vpop.f32.mrb[3].mxu1 }
 0x1d7   : > { %v4071_v5 = vpop.f32.mrb[4].mxu1 }
 0x1d8   : > { %v1484_v37 = vpop.f32.mrb[5].mxu1 }
 0x1d9   : > { %v4072_v47 = vpop.f32.mrb[6].mxu1 }
 0x1da   : > { %v1487_v17 = vpop.f32.mrb[7].mxu1 }
 0x1df   : > { %v4075_v18 = vpop.f32.mrb[8].mxu1 }
 0x1e0   : > { %v1500_v32 = vpop.f32.mrb[9].mxu1 }
 0x1e1   : > { %v4076_v20 = vpop.f32.mrb[10].mxu1 }
 0x1e2   : > { %v5163_v0 = vpop.f32.mrb[11].mxu1 }
 0x1e7   : > { %v5165_v62 = vpop.f32.mrb[12].mxu1 }
 0x1e8   : > { %v5167_v25 = vpop.f32.mrb[13].mxu1 }
 0x1e9   : > { %v5169_v14 = vpop.f32.mrb[14].mxu1 }
 0x1ea   : > { %v5171_v26 = vpop.f32.mrb[15].mxu1 }
 0x1ef   : > { %v5173_v48 = vpop.f32.mrb[16].mxu1 }
 0x1f0   : > { %v5175_v16 = vpop.f32.mrb[17].mxu1 }
 0x1f1   : > { %v5177_v31 = vpop.f32.mrb[18].mxu1 }
 0x1f2   : > { %v5179_v33 = vpop.f32.mrb[19].mxu1 }
 0x1f7   : > { %v4257_v28 = vpop.f32.mrb[0].mxu0 }
 0x1f8   : > { %v4293_v38 = vadd.f32 %v4257_v28, %v4067_v23  ;;  %v3098_v39 = vpop.f32.mrb[1].mxu0 }
 0x1f9   : > { %v4294_v43 = vadd.f32 %v3098_v39, %v1468_v11  ;;  %v4258_v13 = vpop.f32.mrb[2].mxu0 }
 0x1fa   : > { %v3281_v30 = vmul.f32 %v4293_v38, %v5182_v36  ;;  %v4295_v42 = vadd.f32 %v4258_v13, %v4068_v12  ;;  %v3101_v44 = vpop.f32.mrb[3].mxu0 }
 0x1fb   : > { %v3279_v46 = vmul.f32 %v4294_v43, %v5182_v36  ;;  %v4296_v8 = vadd.f32 %v3101_v44, %v1471_v15 }
 0x1fc   : > { %v3324_v34 = vadd.f32 %v5187_v40, %v3281_v30  ;;  %v3282_v50 = vmul.f32 %v4295_v42, %v5182_v36 }
 0x1fd   : > { %v3322_v49 = vadd.f32 %v5187_v40, %v3279_v46  ;;  %v3280_v2 = vmul.f32 %v4296_v8, %v5182_v36 }
 0x1fe   : > { %3361 = vst.msk [vmem:[%s5193_s17 + $0x10] sm:$0xff] %vm3358_vm2, %v3324_v34  ;;  %v3325_v51 = vadd.f32 %v5187_v40, %v3282_v50 }
 0x1ff   : > { %3359 = vst.msk [vmem:[%s5193_s17] sm:$0xff] %vm3358_vm2, %v3322_v49  ;;  %v3323_v52 = vadd.f32 %v5187_v40, %v3280_v2  ;;  %v4261_v19 = vpop.f32.mrb[4].mxu0 }
 0x200   : > { %3362 = vst.msk [vmem:[%s5193_s17 + $0x18] sm:$0xff] %vm3358_vm2, %v3325_v51  ;;  %v4297_v22 = vadd.f32 %v4261_v19, %v4071_v5  ;;  %v3114_v53 = vpop.f32.mrb[5].mxu0 }
 0x201   : > { %3360 = vst.msk [vmem:[%s5193_s17 + $0x8] sm:$0xff] %vm3358_vm2, %v3323_v52  ;;  %v4298_v55 = vadd.f32 %v3114_v53, %v1484_v37  ;;  %v4262_v57 = vpop.f32.mrb[6].mxu0 }
 0x202   : > { %v3285_v45 = vmul.f32 %v4297_v22, %v5182_v36  ;;  %v4299_v24 = vadd.f32 %v4262_v57, %v4072_v47  ;;  %v3117_v27 = vpop.f32.mrb[7].mxu0 }
 0x203   : > { %v3283_v56 = vmul.f32 %v4298_v55, %v5182_v36  ;;  %v4300_v59 = vadd.f32 %v3117_v27, %v1487_v17 }
 0x204   : > { %v3328_v4 = vadd.f32 %v5187_v40, %v3285_v45  ;;  %v3286_v60 = vmul.f32 %v4299_v24, %v5182_v36 }
 0x205   : > { %v3326_v29 = vadd.f32 %v5187_v40, %v3283_v56  ;;  %v3284_v41 = vmul.f32 %v4300_v59, %v5182_v36 }
 0x206   : > { %3365 = vst.msk [vmem:[%s5193_s17 + $0x30] sm:$0xff] %vm3358_vm2, %v3328_v4  ;;  %v3329_v61 = vadd.f32 %v5187_v40, %v3286_v60 }
 0x207   : > { %3363 = vst.msk [vmem:[%s5193_s17 + $0x20] sm:$0xff] %vm3358_vm2, %v3326_v29  ;;  %v3327_v63 = vadd.f32 %v5187_v40, %v3284_v41  ;;  %v4265_v1 = vpop.f32.mrb[8].mxu0 }
 0x208   : > { %3366 = vst.msk [vmem:[%s5193_s17 + $0x38] sm:$0xff] %vm3358_vm2, %v3329_v61  ;;  %v4301_v7 = vadd.f32 %v4265_v1, %v4075_v18  ;;  %v3130_v9 = vpop.f32.mrb[9].mxu0 }
 0x209   : > { %3364 = vst.msk [vmem:[%s5193_s17 + $0x28] sm:$0xff] %vm3358_vm2, %v3327_v63  ;;  %v4302_v35 = vadd.f32 %v3130_v9, %v1500_v32  ;;  %v4266_v3 = vpop.f32.mrb[10].mxu0 }
 0x20a   : > { %v3289_v6 = vmul.f32 %v4301_v7, %v5182_v36  ;;  %v4303_v21 = vadd.f32 %v4266_v3, %v4076_v20  ;;  %v3133_v10 = vpop.f32.mrb[11].mxu0 }
 0x20b   : > { %v3287_v58 = vmul.f32 %v4302_v35, %v5182_v36  ;;  %v4304_v54 = vadd.f32 %v3133_v10, %v5163_v0 }
 0x20c   : > { %v3332_v23 = vadd.f32 %v5187_v40, %v3289_v6  ;;  %v3290_v11 = vmul.f32 %v4303_v21, %v5182_v36 }
 0x20d   : > { %v3330_v12 = vadd.f32 %v5187_v40, %v3287_v58  ;;  %v3288_v15 = vmul.f32 %v4304_v54, %v5182_v36 }
 0x20e   : > { %3369 = vst.msk [vmem:[%s5193_s17 + $0x50] sm:$0xff] %vm3358_vm2, %v3332_v23  ;;  %v3333_v5 = vadd.f32 %v5187_v40, %v3290_v11 }
 0x20f   : > { %3367 = vst.msk [vmem:[%s5193_s17 + $0x40] sm:$0xff] %vm3358_vm2, %v3330_v12  ;;  %v3331_v37 = vadd.f32 %v5187_v40, %v3288_v15  ;;  %v4269_v47 = vpop.f32.mrb[12].mxu0 }
 0x210   : > { %3370 = vst.msk [vmem:[%s5193_s17 + $0x58] sm:$0xff] %vm3358_vm2, %v3333_v5  ;;  %v4305_v17 = vadd.f32 %v4269_v47, %v5165_v62  ;;  %v3146_v18 = vpop.f32.mrb[13].mxu0 }
 0x211   : > { %3368 = vst.msk [vmem:[%s5193_s17 + $0x48] sm:$0xff] %vm3358_vm2, %v3331_v37  ;;  %v4306_v32 = vadd.f32 %v3146_v18, %v5167_v25  ;;  %v4270_v20 = vpop.f32.mrb[14].mxu0 }
 0x212   : > { %v3293_v0 = vmul.f32 %v4305_v17, %v5182_v36  ;;  %v4307_v28 = vadd.f32 %v4270_v20, %v5169_v14  ;;  %v3149_v38 = vpop.f32.mrb[15].mxu0 }
 0x213   : > { %v3291_v39 = vmul.f32 %v4306_v32, %v5182_v36  ;;  %v4308_v43 = vadd.f32 %v3149_v38, %v5171_v26 }
 0x214   : > { %v3336_v62 = vadd.f32 %v5187_v40, %v3293_v0  ;;  %v3294_v13 = vmul.f32 %v4307_v28, %v5182_v36 }
 0x215   : > { %v3334_v30 = vadd.f32 %v5187_v40, %v3291_v39  ;;  %v3292_v25 = vmul.f32 %v4308_v43, %v5182_v36 }
 0x216   : > { %3373 = vst.msk [vmem:[%s5193_s17 + $0x70] sm:$0xff] %vm3358_vm2, %v3336_v62  ;;  %v3337_v42 = vadd.f32 %v5187_v40, %v3294_v13 }
 0x217   : > { %v4125_v44 = vpop.f32.mrb[20].mxu1  ;;  %3371 = vst.msk [vmem:[%s5193_s17 + $0x60] sm:$0xff] %vm3358_vm2, %v3334_v30  ;;  %v3335_v14 = vadd.f32 %v5187_v40, %v3292_v25  ;;  %v4273_v46 = vpop.f32.mrb[16].mxu0 }
 0x218   : > { %v1874_v26 = vpop.f32.mrb[21].mxu1  ;;  %3374 = vst.msk [vmem:[%s5193_s17 + $0x78] sm:$0xff] %vm3358_vm2, %v3337_v42  ;;  %v4309_v8 = vadd.f32 %v4273_v46, %v5173_v48  ;;  %v3162_v34 = vpop.f32.mrb[17].mxu0 }
 0x219   : > { %v4126_v50 = vpop.f32.mrb[22].mxu1  ;;  %3372 = vst.msk [vmem:[%s5193_s17 + $0x68] sm:$0xff] %vm3358_vm2, %v3335_v14  ;;  %v4310_v49 = vadd.f32 %v3162_v34, %v5175_v16  ;;  %v4274_v2 = vpop.f32.mrb[18].mxu0 }
 0x21a   : > { %v1877_v51 = vpop.f32.mrb[23].mxu1  ;;  %v3297_v52 = vmul.f32 %v4309_v8, %v5182_v36  ;;  %v4311_v19 = vadd.f32 %v4274_v2, %v5177_v31  ;;  %v3165_v22 = vpop.f32.mrb[19].mxu0 }
 0x21b   : > { %v3295_v53 = vmul.f32 %v4310_v49, %v5182_v36  ;;  %v4312_v48 = vadd.f32 %v3165_v22, %v5179_v33 }
 0x21c   : > { %v3340_v55 = vadd.f32 %v5187_v40, %v3297_v52  ;;  %v3298_v57 = vmul.f32 %v4311_v19, %v5182_v36 }
 0x21d   : > { %v3338_v45 = vadd.f32 %v5187_v40, %v3295_v53  ;;  %v3296_v16 = vmul.f32 %v4312_v48, %v5182_v36 }
 0x21e   : > { %3377 = vst.msk [vmem:[%s5193_s17 + $0x90] sm:$0xff] %vm3358_vm2, %v3340_v55  ;;  %v3341_v24 = vadd.f32 %v5187_v40, %v3298_v57 }
 0x21f   : > { %v4129_v27 = vpop.f32.mrb[24].mxu1  ;;  %3375 = vst.msk [vmem:[%s5193_s17 + $0x80] sm:$0xff] %vm3358_vm2, %v3338_v45  ;;  %v3339_v31 = vadd.f32 %v5187_v40, %v3296_v16  ;;  %v4277_v56 = vpop.f32.mrb[20].mxu0 }
 0x220   : > { %v1890_v33 = vpop.f32.mrb[25].mxu1  ;;  %3378 = vst.msk [vmem:[%s5193_s17 + $0x98] sm:$0xff] %vm3358_vm2, %v3341_v24  ;;  %v4313_v59 = vadd.f32 %v4277_v56, %v4125_v44  ;;  %v3178_v4 = vpop.f32.mrb[21].mxu0 }
 0x221   : > { %v4130_v60 = vpop.f32.mrb[26].mxu1  ;;  %3376 = vst.msk [vmem:[%s5193_s17 + $0x88] sm:$0xff] %vm3358_vm2, %v3339_v31  ;;  %v4314_v29 = vadd.f32 %v3178_v4, %v1874_v26  ;;  %v4278_v41 = vpop.f32.mrb[22].mxu0 }
 0x222   : > { %v1893_v61 = vpop.f32.mrb[27].mxu1  ;;  %v3301_v63 = vmul.f32 %v4313_v59, %v5182_v36  ;;  %v4315_v1 = vadd.f32 %v4278_v41, %v4126_v50  ;;  %v3181_v7 = vpop.f32.mrb[23].mxu0 }
 0x223   : > { %v3299_v9 = vmul.f32 %v4314_v29, %v5182_v36  ;;  %v4316_v35 = vadd.f32 %v3181_v7, %v1877_v51 }
 0x224   : > { %v3344_v3 = vadd.f32 %v5187_v40, %v3301_v63  ;;  %v3302_v6 = vmul.f32 %v4315_v1, %v5182_v36 }
 0x225   : > { %v3342_v21 = vadd.f32 %v5187_v40, %v3299_v9  ;;  %v3300_v10 = vmul.f32 %v4316_v35, %v5182_v36 }
 0x226   : > { %3381 = vst.msk [vmem:[%s5193_s17 + $0xb0] sm:$0xff] %vm3358_vm2, %v3344_v3  ;;  %v3345_v58 = vadd.f32 %v5187_v40, %v3302_v6 }
 0x227   : > { %v4133_v54 = vpop.f32.mrb[28].mxu1  ;;  %3379 = vst.msk [vmem:[%s5193_s17 + $0xa0] sm:$0xff] %vm3358_vm2, %v3342_v21  ;;  %v3343_v23 = vadd.f32 %v5187_v40, %v3300_v10  ;;  %v4281_v11 = vpop.f32.mrb[24].mxu0 }
 0x228   : > { %v1906_v12 = vpop.f32.mrb[29].mxu1  ;;  %3382 = vst.msk [vmem:[%s5193_s17 + $0xb8] sm:$0xff] %vm3358_vm2, %v3345_v58  ;;  %v4317_v15 = vadd.f32 %v4281_v11, %v4129_v27  ;;  %v3194_v5 = vpop.f32.mrb[25].mxu0 }
 0x229   : > { %v4134_v37 = vpop.f32.mrb[30].mxu1  ;;  %3380 = vst.msk [vmem:[%s5193_s17 + $0xa8] sm:$0xff] %vm3358_vm2, %v3343_v23  ;;  %v4318_v47 = vadd.f32 %v3194_v5, %v1890_v33  ;;  %v4282_v17 = vpop.f32.mrb[26].mxu0 }
 0x22a   : > { %v1909_v18 = vpop.f32.mrb[31].mxu1  ;;  %v3305_v32 = vmul.f32 %v4317_v15, %v5182_v36  ;;  %v4319_v20 = vadd.f32 %v4282_v17, %v4130_v60  ;;  %v3197_v0 = vpop.f32.mrb[27].mxu0 }
 0x22b   : > { %v3303_v28 = vmul.f32 %v4318_v47, %v5182_v36  ;;  %v4320_v38 = vadd.f32 %v3197_v0, %v1893_v61 }
 0x22c   : > { %v3348_v39 = vadd.f32 %v5187_v40, %v3305_v32  ;;  %v3306_v43 = vmul.f32 %v4319_v20, %v5182_v36 }
 0x22d   : > { %v3346_v62 = vadd.f32 %v5187_v40, %v3303_v28  ;;  %v3304_v13 = vmul.f32 %v4320_v38, %v5182_v36 }
 0x22e   : > { %3385 = vst.msk [vmem:[%s5193_s17 + $0xd0] sm:$0xff] %vm3358_vm2, %v3348_v39  ;;  %v3349_v30 = vadd.f32 %v5187_v40, %v3306_v43 }
 0x22f   : > { %v4137_v25 = vpop.f32.mrb[32].mxu1  ;;  %3383 = vst.msk [vmem:[%s5193_s17 + $0xc0] sm:$0xff] %vm3358_vm2, %v3346_v62  ;;  %v3347_v42 = vadd.f32 %v5187_v40, %v3304_v13  ;;  %v4285_v44 = vpop.f32.mrb[28].mxu0 }
 0x230   : > { %v1922_v14 = vpop.f32.mrb[33].mxu1  ;;  %3386 = vst.msk [vmem:[%s5193_s17 + $0xd8] sm:$0xff] %vm3358_vm2, %v3349_v30  ;;  %v4321_v46 = vadd.f32 %v4285_v44, %v4133_v54  ;;  %v3210_v26 = vpop.f32.mrb[29].mxu0 }
 0x231   : > { %v4138_v8 = vpop.f32.mrb[34].mxu1  ;;  %3384 = vst.msk [vmem:[%s5193_s17 + $0xc8] sm:$0xff] %vm3358_vm2, %v3347_v42  ;;  %v4322_v34 = vadd.f32 %v3210_v26, %v1906_v12  ;;  %v4286_v50 = vpop.f32.mrb[30].mxu0 }
 0x232   : > { %v1925_v49 = vpop.f32.mrb[35].mxu1  ;;  %v3309_v2 = vmul.f32 %v4321_v46, %v5182_v36  ;;  %v4323_v51 = vadd.f32 %v4286_v50, %v4134_v37  ;;  %v3213_v52 = vpop.f32.mrb[31].mxu0 }
 0x233   : > { %v3307_v19 = vmul.f32 %v4322_v34, %v5182_v36  ;;  %v4324_v22 = vadd.f32 %v3213_v52, %v1909_v18 }
 0x234   : > { %v3352_v53 = vadd.f32 %v5187_v40, %v3309_v2  ;;  %v3310_v48 = vmul.f32 %v4323_v51, %v5182_v36 }
 0x235   : > { %v3350_v55 = vadd.f32 %v5187_v40, %v3307_v19  ;;  %v3308_v57 = vmul.f32 %v4324_v22, %v5182_v36 }
 0x236   : > { %3389 = vst.msk [vmem:[%s5193_s17 + $0xf0] sm:$0xff] %vm3358_vm2, %v3352_v53  ;;  %v3353_v45 = vadd.f32 %v5187_v40, %v3310_v48 }
 0x237   : > { %3387 = vst.msk [vmem:[%s5193_s17 + $0xe0] sm:$0xff] %vm3358_vm2, %v3350_v55  ;;  %v3351_v16 = vadd.f32 %v5187_v40, %v3308_v57  ;;  %v4289_v24 = vpop.f32.mrb[32].mxu0 }
 0x238   : > { %3390 = vst.msk [vmem:[%s5193_s17 + $0xf8] sm:$0xff] %vm3358_vm2, %v3353_v45  ;;  %v4325_v27 = vadd.f32 %v4289_v24, %v4137_v25  ;;  %v3226_v31 = vpop.f32.mrb[33].mxu0 }
 0x239   : > { %3388 = vst.msk [vmem:[%s5193_s17 + $0xe8] sm:$0xff] %vm3358_vm2, %v3351_v16  ;;  %v4326_v56 = vadd.f32 %v3226_v31, %v1922_v14  ;;  %v4290_v33 = vpop.f32.mrb[34].mxu0 }
 0x23a   : > { %v3313_v59 = vmul.f32 %v4325_v27, %v5182_v36  ;;  %v4327_v4 = vadd.f32 %v4290_v33, %v4138_v8  ;;  %v3229_v60 = vpop.f32.mrb[35].mxu0 }
 0x23b   : > { %v3311_v29 = vmul.f32 %v4326_v56, %v5182_v36  ;;  %v4328_v41 = vadd.f32 %v3229_v60, %v1925_v49 }
 0x23c   : > { %v3356_v61 = vadd.f32 %v5187_v40, %v3313_v59  ;;  %v3314_v63 = vmul.f32 %v4327_v4, %v5182_v36 }
 0x23d   : > { %v3354_v1 = vadd.f32 %v5187_v40, %v3311_v29  ;;  %v3312_v7 = vmul.f32 %v4328_v41, %v5182_v36 }
 0x23e   : > { %3393 = vst.msk [vmem:[%s5193_s17 + $0x110] sm:$0xff] %vm3358_vm2, %v3356_v61  ;;  %v3357_v9 = vadd.f32 %v5187_v40, %v3314_v63 }
 0x23f   : > { %3391 = vst.msk [vmem:[%s5193_s17 + $0x100] sm:$0xff] %vm3358_vm2, %v3354_v1  ;;  %v3355_v35 = vadd.f32 %v5187_v40, %v3312_v7 }
 0x240   : > { %3394 = vst.msk [vmem:[%s5193_s17 + $0x118] sm:$0xff] %vm3358_vm2, %v3357_v9 }
 0x241   : > { %3392 = vst.msk [vmem:[%s5193_s17 + $0x108] sm:$0xff] %vm3358_vm2, %v3355_v35 }
 0x242 PF: > { %s15_s19 = sadd.s32 1, %s4658_s19   ;;  %s5361_s17 = smov %s4654_s18 }
 0x243   : > { %p12_p5 = scmp.ge.s32.totalorder %s15_s19, 4   ;;  %s5362_s18 = smov %s5364_s0 }
 0x245   :  { %14 = sbr.rel (!%p12_p5) target bundleno = 2 (0x2), region = 80 }

</bundles_post_ra>
